<compile_context>
chip_gen: v6e
topology: v6e:2x2x1
jax: 0.10.0
libtpu: 0.0.40
codegen_flags: <defaults>
</compile_context>

<pallas_src>
import functools

import jax
import jax.numpy as jnp
from jax import lax
from jax.experimental import pallas as pl
from jax.experimental.pallas import tpu as pltpu


# -----------------------------------------------------------------------------
# Phase 1: LSTM recurrence over time chunks.
# -----------------------------------------------------------------------------
def _lstm_phase_kernel(Tc, Bb, Hp,
                       e_ref,       # (Tc*Bb, Ep)  bf16  embeddings, (t, b) row order
                       wih_ref,     # (Ep, 4*Hp)   bf16
                       whh_ref,     # (Hp, 4*Hp)   bf16
                       bias_ref,    # (1, 4*Hp)    f32   b_ih + b_hh
                       lens_ref,    # (Bb, 1)      i32
                       tv_out_ref,  # (Bb, Hp)     f32   hidden at last valid step
                       gx_ref,      # (Tc*Bb, 4*Hp) f32  scratch: chunk gate pre-acts
                       h_ref, c_ref, tv_ref):  # (Bb, Hp) f32 scratch carries
    f32 = jnp.float32
    c_idx = pl.program_id(1)

    @pl.when(c_idx == 0)
    def _init():
        h_ref[...] = jnp.zeros_like(h_ref)
        c_ref[...] = jnp.zeros_like(c_ref)
        tv_ref[...] = jnp.zeros_like(tv_ref)

    # Hoisted input projection for this chunk: one big MXU matmul, off the
    # critical path of the recurrence.
    gx_ref[...] = (jnp.dot(e_ref[...], wih_ref[...],
                           preferred_element_type=f32) + bias_ref[...])

    last = lens_ref[...] - 1                       # (Bb, 1)
    base_t = c_idx * Tc

    # TODO(synk): latch W_hh in MXU weight registers across the chunk via
    # pltpu.matmul_push_rhs / matmul_acc_lhs / matmul_pop (RHS constant over
    # all steps) to shave weight-load latency off the serial h->h chain.
    def step(s, carry):
        h, c, tv = carry
        row = pl.multiple_of(s * Bb, Bb)
        gates = gx_ref[pl.ds(row, Bb), :] + jnp.dot(
            h.astype(whh_ref.dtype), whh_ref[...], preferred_element_type=f32)
        i_g = jax.nn.sigmoid(gates[:, 0 * Hp:1 * Hp])   # PyTorch gate order i,f,g,o
        f_g = jax.nn.sigmoid(gates[:, 1 * Hp:2 * Hp])
        g_g = jnp.tanh(gates[:, 2 * Hp:3 * Hp])
        o_g = jax.nn.sigmoid(gates[:, 3 * Hp:4 * Hp])
        c = f_g * c + i_g * g_g
        h = o_g * jnp.tanh(c)
        tv = jnp.where(last == base_t + s, h, tv)       # capture at last valid step
        return h, c, tv

    h, c, tv = lax.fori_loop(0, Tc, step,
                             (h_ref[...], c_ref[...], tv_ref[...]),
                             unroll=min(Tc, 8))
    h_ref[...] = h
    c_ref[...] = c
    tv_ref[...] = tv

    @pl.when(c_idx == pl.num_programs(1) - 1)
    def _fin():
        tv_out_ref[...] = tv_ref[...]


# -----------------------------------------------------------------------------
# Phase 2: streaming masked exp(cosine) attention + linear + sigmoid.
# -----------------------------------------------------------------------------
def _att_phase_kernel(Tc, Bb,
                      e_ref,      # (Tc*Bb, Ep) bf16
                      um_ref,     # (Bb, Ep)    f32  u_mix = (1-lam)*u_n + lam*tv_n
                      uu_ref,     # (Bb, 1)     f32  ||u_mix||^2
                      lens_ref,   # (Bb, 1)     i32
                      lw_ref,     # (Ep, 1)     f32  linear weight (transposed)
                      lb_ref,     # (1, 1)      f32
                      out_ref,    # (Bb, 1)     f32
                      ssum_ref,   # (Bb, 1)     f32 scratch: softmax denominator
                      eacc_ref):  # (Bb, Ep)    f32 scratch: weighted embed sum
    f32 = jnp.float32
    c_idx = pl.program_id(1)

    @pl.when(c_idx == 0)
    def _init():
        ssum_ref[...] = jnp.zeros_like(ssum_ref)
        eacc_ref[...] = jnp.zeros_like(eacc_ref)

    um = um_ref[...]
    uu = uu_ref[...]
    lens = lens_ref[...]
    base_t = c_idx * Tc

    def step(s, carry):
        s_sum, e_acc = carry
        row = pl.multiple_of(s * Bb, Bb)
        e_t = e_ref[pl.ds(row, Bb), :].astype(f32)               # (Bb, Ep)
        dots = jnp.sum(e_t * um, axis=1, keepdims=True)          # (Bb, 1)
        ee = jnp.sum(e_t * e_t, axis=1, keepdims=True)           # (Bb, 1)
        # cos = dot / max(|e||u|, 1e-8) == dot * rsqrt(max(ee*uu, 1e-16))
        cos = dots * lax.rsqrt(jnp.maximum(ee * uu, 1e-16))
        sim = jnp.where(base_t + s < lens, jnp.exp(cos), 0.0)    # mask t < len
        return s_sum + sim, e_acc + sim * e_t

    s_sum, e_acc = lax.fori_loop(0, Tc, step,
                                 (ssum_ref[...], eacc_ref[...]),
                                 unroll=min(Tc, 8))
    ssum_ref[...] = s_sum
    eacc_ref[...] = e_acc

    @pl.when(c_idx == pl.num_programs(1) - 1)
    def _fin():
        # approx reciprocal is safe here: denominator is a sum of exps (> 0).
        embeds_ave = eacc_ref[...] * pl.reciprocal(ssum_ref[...], approx=True)
        score = jnp.dot(embeds_ave, lw_ref[...],
                        preferred_element_type=f32) + lb_ref[...]
        out_ref[...] = jax.nn.sigmoid(score)


# -----------------------------------------------------------------------------
# Wrapper.
# -----------------------------------------------------------------------------
def _round_up(x, m):
    return ((x + m - 1) // m) * m


def _pad_gate_cols(w, H, Hp):
    """(rows, 4H) -> (rows, 4Hp): zero-pad each gate block to Hp lanes."""
    blocks = [jnp.pad(w[:, g * H:(g + 1) * H], ((0, 0), (0, Hp - H)))
              for g in range(4)]
    return jnp.concatenate(blocks, axis=1)


def _vmem_limit(need_bytes):
    """Per-generation VMEM budget with headroom (no arbitrary clamp)."""
    try:
        cap = int(pltpu.get_tpu_info().vmem_capacity_bytes)
    except Exception:                      # conservative fallback (v7x-sized)
        cap = 64 << 20
    hi = max(int(cap * 3 // 4), 32 << 20)
    return int(min(max(need_bytes + (8 << 20), 32 << 20), hi))


def wac_att_t_forward(X, lens, params, lam=0.1):
    """JAX/Pallas equivalent of WAC_ATT_T.forward(X, lens) -> prob (B, 1)."""
    embed_table, w_ih, w_hh, b_ih, b_hh, u, lin_w, lin_b = params
    B, T = X.shape
    E = embed_table.shape[1]
    H = w_hh.shape[1]
    assert H == E, "`(1-lam)*u + lam*tv` broadcast requires hidden_dim == embedding_dim"

    LANE, SUB = 128, 16            # 16 sublanes: bf16 sublane packing (v6e/v7x)
    Ep = _round_up(E, LANE)
    Hp = _round_up(H, LANE)        # == Ep since H == E
    f32, bf16 = jnp.float32, jnp.bfloat16

    # Batch blocking: Bb rows per block; block axis is a parallel grid dim
    # (sharded across TensorCores on v7x).
    Bb = _round_up(B, SUB) if B <= 64 else 64
    Bp = _round_up(B, Bb)
    num_b = Bp // Bb

    # Time chunking: bounds VMEM (streamed embeddings + chunk gate scratch) to
    # O(Tc) regardless of T and gives DMA/compute overlap via double-buffering.
    max_tc = 32
    while max_tc > 8 and max_tc * Bb * 4 * Hp * 4 > (8 << 20):
        max_tc //= 2
    num_tc = -(-T // max_tc)
    Tc = -(-T // num_tc)
    Tp = Tc * num_tc

    # ---- glue: pad, gather embeddings, lay out time-major per batch block ----
    Xp = jnp.zeros((Bp, Tp), X.dtype).at[:B, :T].set(X)        # pad: token 0
    lens_i = lens.astype(jnp.int32)
    lens_p = jnp.ones((Bp,), jnp.int32).at[:B].set(lens_i)     # pad rows: len 1
    lens_col = lens_p[:, None]                                 # (Bp, 1)

    emb = embed_table[Xp].astype(f32)                          # (Bp, Tp, E)
    emb = jnp.pad(emb, ((0, 0), (0, 0), (0, Ep - E)))          # (Bp, Tp, Ep)
    # (num_b, Tp*Bb, Ep): per batch block, rows ordered (t, b) so every
    # (Tc*Bb, Ep) tile is one contiguous, lane/sublane-aligned BlockSpec block.
    emb_blk = (emb.reshape(num_b, Bb, Tp, Ep)
               .transpose(0, 2, 1, 3)
               .reshape(num_b, Tp * Bb, Ep)
               .astype(bf16))

    # ---- weights: transpose + per-gate lane padding ---------------------------
    wih_p = _pad_gate_cols(jnp.transpose(w_ih).astype(f32), H, Hp)        # (E, 4Hp)
    wih_p = jnp.pad(wih_p, ((0, Ep - E), (0, 0))).astype(bf16)            # (Ep, 4Hp)
    whh_p = _pad_gate_cols(jnp.transpose(w_hh).astype(f32), H, Hp)        # (H, 4Hp)
    whh_p = jnp.pad(whh_p, ((0, Hp - H), (0, 0))).astype(bf16)            # (Hp, 4Hp)
    bias_p = _pad_gate_cols((b_ih + b_hh).astype(f32)[None, :], H, Hp)    # (1, 4Hp)
    lw_p = jnp.pad(jnp.transpose(lin_w).astype(f32), ((0, Ep - E), (0, 0)))  # (Ep, 1)
    lb_p = lin_b.astype(f32).reshape(1, 1)

    e_spec = pl.BlockSpec((None, Tc * Bb, Ep), lambda b, c: (b, c, 0))
    full = lambda shape: pl.BlockSpec(shape, lambda b, c: (0,) * len(shape))
    per_b = lambda shape: pl.BlockSpec(
        shape, lambda b, c: (b,) + (0,) * (len(shape) - 1))

    # ---- phase 1: LSTM recurrence -> hidden state at each row's last step -----
    e_blk_bytes = 2 * Tc * Bb * Ep * 2                 # double-buffered bf16 tile
    need1 = (e_blk_bytes
             + 2 * (Ep + Hp) * 4 * Hp * 2              # W_ih, W_hh
             + 2 * 8 * 4 * Hp * 4                      # bias (sublane-padded)
             + 2 * Bb * LANE * 4                       # lens (lane-padded)
             + 2 * Bb * Hp * 4                         # tv output block
             + Tc * Bb * 4 * Hp * 4                    # gate scratch
             + 3 * Bb * Hp * 4)                        # h / c / tv scratch
    lstm_kernel = functools.partial(_lstm_phase_kernel, int(Tc), int(Bb), int(Hp))
    tv_last = pl.pallas_call(
        lstm_kernel,
        out_shape=jax.ShapeDtypeStruct((Bp, Hp), f32),
        grid_spec=pltpu.PrefetchScalarGridSpec(
            num_scalar_prefetch=0,
            grid=(num_b, num_tc),
            in_specs=[e_spec,
                      full((Ep, 4 * Hp)),
                      full((Hp, 4 * Hp)),
                      full((1, 4 * Hp)),
                      per_b((Bb, 1))],
            out_specs=per_b((Bb, Hp)),
            scratch_shapes=[pltpu.VMEM((Tc * Bb, 4 * Hp), f32),
                            pltpu.VMEM((Bb, Hp), f32),
                            pltpu.VMEM((Bb, Hp), f32),
                            pltpu.VMEM((Bb, Hp), f32)]),
        compiler_params=pltpu.CompilerParams(
            dimension_semantics=("parallel", "arbitrary"),
            vmem_limit_bytes=_vmem_limit(need1)),
    )(emb_blk, wih_p, whh_p, bias_p, lens_col)

    # ---- tiny O(B*E) glue between phases: torch boolean-mask row order + exact
    #      division normalisation (replaces in-kernel O(B^2 H) one-hot matmul) --
    tv = tv_last[:, :H]
    perm = jnp.argsort(lens_i, stable=True).astype(jnp.int32)
    if Bp > B:
        perm = jnp.concatenate([perm, jnp.arange(B, Bp, dtype=jnp.int32)])
    tv = tv[perm]                                       # tv[i] = h_last[perm[i]]
    tv_n = tv / jnp.sum(tv, axis=1, keepdims=True)      # exact division
    u_n = u.astype(f32) / jnp.sum(u.astype(f32))
    u_mix = (1.0 - float(lam)) * u_n[None, :] + float(lam) * tv_n   # (Bp, E)
    uu = jnp.sum(u_mix * u_mix, axis=1, keepdims=True)              # (Bp, 1)
    um_p = jnp.pad(u_mix, ((0, 0), (0, Ep - E)))                    # (Bp, Ep)

    # ---- phase 2: streaming attention + linear + sigmoid ----------------------
    need2 = (e_blk_bytes
             + 2 * Bb * Ep * 4                         # u_mix block
             + 6 * Bb * LANE * 4                       # uu / lens / out
             + 2 * Ep * LANE * 4                       # linear weight
             + Bb * Ep * 4 + Bb * LANE * 4)            # attention accumulators
    att_kernel = functools.partial(_att_phase_kernel, int(Tc), int(Bb))
    prob = pl.pallas_call(
        att_kernel,
        out_shape=jax.ShapeDtypeStruct((Bp, 1), f32),
        grid_spec=pltpu.PrefetchScalarGridSpec(
            num_scalar_prefetch=0,
            grid=(num_b, num_tc),
            in_specs=[e_spec,
                      per_b((Bb, Ep)),
                      per_b((Bb, 1)),
                      per_b((Bb, 1)),
                      full((Ep, 1)),
                      full((1, 1))],
            out_specs=per_b((Bb, 1)),
            scratch_shapes=[pltpu.VMEM((Bb, 1), f32),
                            pltpu.VMEM((Bb, Ep), f32)]),
        compiler_params=pltpu.CompilerParams(
            dimension_semantics=("parallel", "arbitrary"),
            vmem_limit_bytes=_vmem_limit(need2)),
    )(emb_blk, um_p, uu, lens_col, lw_p, lb_p)

    return prob[:B]


def init_params(key, vocab_size, embedding_dim, hidden_dim):
    ks = jax.random.split(key, 8)
    E, H, V = embedding_dim, hidden_dim, vocab_size
    embed_table = 0.2 * (jax.random.uniform(ks[0], (V, E), jnp.float32) - 0.5)
    kb = 1.0 / jnp.sqrt(jnp.float32(H))
    w_ih = jax.random.uniform(ks[1], (4 * H, E), jnp.float32, -kb, kb)
    w_hh = jax.random.uniform(ks[2], (4 * H, H), jnp.float32, -kb, kb)
    b_ih = jax.random.uniform(ks[3], (4 * H,), jnp.float32, -kb, kb)
    b_hh = jax.random.uniform(ks[4], (4 * H,), jnp.float32, -kb, kb)
    u = jax.random.normal(ks[5], (E,), jnp.float32)
    kl = 1.0 / jnp.sqrt(jnp.float32(E))
    lin_w = jax.random.uniform(ks[6], (1, E), jnp.float32, -kl, kl)
    lin_b = jax.random.uniform(ks[7], (1,), jnp.float32, -kl, kl)
    return (embed_table, w_ih, w_hh, b_ih, b_hh, u, lin_w, lin_b)


if __name__ == "__main__":
    # Small, deterministic example consistent with the module:
    #   batch=4, maxlen=8, embedding_dim = hidden_dim = 32, vocab=50.
    key = jax.random.PRNGKey(0)
    k_params, k_x = jax.random.split(key)

    vocab_size, embedding_dim, hidden_dim = 50, 32, 32
    B, T = 4, 8

    params = init_params(k_params, vocab_size, embedding_dim, hidden_dim)
    X = jax.random.randint(k_x, (B, T), 0, vocab_size, dtype=jnp.int32)
    lens = jnp.array([5, 8, 3, 6], dtype=jnp.int32)

    prob = wac_att_t_forward(X, lens, params, lam=0.1)
    prob = jax.block_until_ready(prob)

    assert prob.shape == (B, 1)
    assert bool(jnp.all(jnp.isfinite(prob)))
    assert bool(jnp.all((prob > 0.0) & (prob < 1.0)))
    print("KERNEL_OK")
</pallas_src>

<mosaic_0001>
module attributes {stable_mosaic.version = 11 : i64} {
  func.func @_lstm_phase_kernel(%arg0: i32, %arg1: i32, %arg2: memref<1x128x128xbf16, #tpu.memory_space<vmem>>, %arg3: memref<128x512xbf16, #tpu.memory_space<vmem>>, %arg4: memref<128x512xbf16, #tpu.memory_space<vmem>>, %arg5: memref<1x512xf32, #tpu.memory_space<vmem>>, %arg6: memref<16x1xi32, #tpu.memory_space<vmem>>, %arg7: memref<16x128xf32, #tpu.memory_space<vmem>>, %arg8: memref<128x512xf32, #tpu.memory_space<vmem>>, %arg9: memref<16x128xf32, #tpu.memory_space<vmem>>, %arg10: memref<16x128xf32, #tpu.memory_space<vmem>>, %arg11: memref<16x128xf32, #tpu.memory_space<vmem>>) attributes {dimension_semantics = [#tpu.dimension_semantics<parallel>, #tpu.dimension_semantics<arbitrary>], iteration_bounds = array<i64: 1, 1>, scalar_prefetch = 0 : i64, scratch_operands = 4 : i64, tpu.core_type = #tpu.core_type<tc>, window_params = [{transform_indices = @transform_0, window_bounds = array<i64: 1, 128, 128>}, {pipeline_mode = #tpu.pipeline_mode<synchronous>, transform_indices = @transform_1, window_bounds = array<i64: 128, 512>}, {pipeline_mode = #tpu.pipeline_mode<synchronous>, transform_indices = @transform_2, window_bounds = array<i64: 128, 512>}, {pipeline_mode = #tpu.pipeline_mode<synchronous>, transform_indices = @transform_3, window_bounds = array<i64: 1, 512>}, {transform_indices = @transform_4, window_bounds = array<i64: 16, 1>}, {transform_indices = @transform_5, window_bounds = array<i64: 16, 128>}]} {
    %c0_i32 = arith.constant 0 : i32
    %0 = arith.cmpi eq, %arg1, %c0_i32 : i32
    %1 = arith.extui %0 : i1 to i32
    %c0_i32_0 = arith.constant 0 : i32
    %2 = arith.cmpi ne, %1, %c0_i32_0 : i32
    scf.if %2 {
      %cst_91 = arith.constant 0.000000e+00 : f32
      %336 = vector.broadcast %cst_91 : f32 to vector<16x128xf32>
      %c0_92 = arith.constant 0 : index
      %c0_93 = arith.constant 0 : index
      %337 = vector.load %arg9[%c0_92, %c0_93] : memref<16x128xf32, #tpu.memory_space<vmem>>, vector<16x128xf32>
      tpu.vector_store %arg9[%c0_92, %c0_93], %336 {strides = array<i32>} : memref<16x128xf32, #tpu.memory_space<vmem>>, vector<16x128xf32>,
      %cst_94 = arith.constant 0.000000e+00 : f32
      %338 = vector.broadcast %cst_94 : f32 to vector<16x128xf32>
      %c0_95 = arith.constant 0 : index
      %c0_96 = arith.constant 0 : index
      %339 = vector.load %arg10[%c0_95, %c0_96] : memref<16x128xf32, #tpu.memory_space<vmem>>, vector<16x128xf32>
      tpu.vector_store %arg10[%c0_95, %c0_96], %338 {strides = array<i32>} : memref<16x128xf32, #tpu.memory_space<vmem>>, vector<16x128xf32>,
      %cst_97 = arith.constant 0.000000e+00 : f32
      %340 = vector.broadcast %cst_97 : f32 to vector<16x128xf32>
      %c0_98 = arith.constant 0 : index
      %c0_99 = arith.constant 0 : index
      %341 = vector.load %arg11[%c0_98, %c0_99] : memref<16x128xf32, #tpu.memory_space<vmem>>, vector<16x128xf32>
      tpu.vector_store %arg11[%c0_98, %c0_99], %340 {strides = array<i32>} : memref<16x128xf32, #tpu.memory_space<vmem>>, vector<16x128xf32>,
    } else {
    }
    %c0 = arith.constant 0 : index
    %c0_1 = arith.constant 0 : index
    %c0_2 = arith.constant 0 : index
    %3 = vector.load %arg2[%c0, %c0_1, %c0_2] : memref<1x128x128xbf16, #tpu.memory_space<vmem>>, vector<1x128x128xbf16>
    %4 = vector.shape_cast %3 : vector<1x128x128xbf16> to vector<128x128xbf16>
    %c0_3 = arith.constant 0 : index
    %c0_4 = arith.constant 0 : index
    %5 = vector.load %arg3[%c0_3, %c0_4] : memref<128x512xbf16, #tpu.memory_space<vmem>>, vector<128x512xbf16>
    %cst = arith.constant dense<0.000000e+00> : vector<128x512xf32>
    %6 = tpu.matmul %4, %5, %cst {dimension_numbers = #tpu.dot_dimension_numbers<[1], [0], [0], [1], [0, 0, 1, 1], [], []>} : vector<128x128xbf16>, vector<128x512xbf16>, vector<128x512xf32> -> vector<128x512xf32>
    %c0_5 = arith.constant 0 : index
    %c0_6 = arith.constant 0 : index
    %7 = vector.load %arg5[%c0_5, %c0_6] : memref<1x512xf32, #tpu.memory_space<vmem>>, vector<1x512xf32>
    %8 = vector.broadcast %7 : vector<1x512xf32> to vector<128x512xf32>
    %9 = arith.addf %6, %8 : vector<128x512xf32>
    %c0_7 = arith.constant 0 : index
    %c0_8 = arith.constant 0 : index
    %10 = vector.load %arg8[%c0_7, %c0_8] : memref<128x512xf32, #tpu.memory_space<vmem>>, vector<128x512xf32>
    tpu.vector_store %arg8[%c0_7, %c0_8], %9 {strides = array<i32>} : memref<128x512xf32, #tpu.memory_space<vmem>>, vector<128x512xf32>,
    %c0_9 = arith.constant 0 : index
    %c0_10 = arith.constant 0 : index
    %11 = vector.load %arg6[%c0_9, %c0_10] : memref<16x1xi32, #tpu.memory_space<vmem>>, vector<16x1xi32>
    %c1_i32 = arith.constant 1 : i32
    %12 = vector.broadcast %c1_i32 : i32 to vector<16x1xi32>
    %13 = arith.subi %11, %12 : vector<16x1xi32>
    %c8_i32 = arith.constant 8 : i32
    %14 = arith.muli %arg1, %c8_i32 : i32
    %c0_11 = arith.constant 0 : index
    %c0_12 = arith.constant 0 : index
    %15 = vector.load %arg9[%c0_11, %c0_12] : memref<16x128xf32, #tpu.memory_space<vmem>>, vector<16x128xf32>
    %c0_13 = arith.constant 0 : index
    %c0_14 = arith.constant 0 : index
    %16 = vector.load %arg10[%c0_13, %c0_14] : memref<16x128xf32, #tpu.memory_space<vmem>>, vector<16x128xf32>
    %c0_15 = arith.constant 0 : index
    %c0_16 = arith.constant 0 : index
    %17 = vector.load %arg11[%c0_15, %c0_16] : memref<16x128xf32, #tpu.memory_space<vmem>>, vector<16x128xf32>
    %c0_i32_17 = arith.constant 0 : i32
    %c16_i32 = arith.constant 16 : i32
    %18 = arith.muli %c0_i32_17, %c16_i32 : i32
    %19 = tpu.assume_multiple %18, 16 : i32
    %20 = arith.index_cast %19 : i32 to index
    %c0_18 = arith.constant 0 : index
    %21 = vector.load %arg8[%20, %c0_18] : memref<128x512xf32, #tpu.memory_space<vmem>>, vector<16x512xf32>
    %22 = arith.truncf %15 : vector<16x128xf32> to vector<16x128xbf16>
    %c0_19 = arith.constant 0 : index
    %c0_20 = arith.constant 0 : index
    %23 = vector.load %arg4[%c0_19, %c0_20] : memref<128x512xbf16, #tpu.memory_space<vmem>>, vector<128x512xbf16>
    %cst_21 = arith.constant dense<0.000000e+00> : vector<16x512xf32>
    %24 = tpu.matmul %22, %23, %cst_21 {dimension_numbers = #tpu.dot_dimension_numbers<[1], [0], [0], [1], [0, 0, 1, 1], [], []>} : vector<16x128xbf16>, vector<128x512xbf16>, vector<16x512xf32> -> vector<16x512xf32>
    %25 = arith.addf %21, %24 : vector<16x512xf32>
    %26 = vector.extract_strided_slice %25 {offsets = [0, 0], sizes = [16, 128], strides = [1, 1]} : vector<16x512xf32> to vector<16x128xf32>
    %27 = arith.negf %26 : vector<16x128xf32>
    %28 = math.exp %27 : vector<16x128xf32>
    %cst_22 = arith.constant 1.000000e+00 : f32
    %29 = vector.broadcast %cst_22 : f32 to vector<16x128xf32>
    %30 = arith.addf %29, %28 : vector<16x128xf32>
    %31 = arith.divf %29, %30 : vector<16x128xf32>
    %32 = vector.extract_strided_slice %25 {offsets = [0, 128], sizes = [16, 128], strides = [1, 1]} : vector<16x512xf32> to vector<16x128xf32>
    %33 = arith.negf %32 : vector<16x128xf32>
    %34 = math.exp %33 : vector<16x128xf32>
    %cst_23 = arith.constant 1.000000e+00 : f32
    %35 = vector.broadcast %cst_23 : f32 to vector<16x128xf32>
    %36 = arith.addf %35, %34 : vector<16x128xf32>
    %37 = arith.divf %35, %36 : vector<16x128xf32>
    %38 = vector.extract_strided_slice %25 {offsets = [0, 256], sizes = [16, 128], strides = [1, 1]} : vector<16x512xf32> to vector<16x128xf32>
    %39 = math.tanh %38 : vector<16x128xf32>
    %40 = vector.extract_strided_slice %25 {offsets = [0, 384], sizes = [16, 128], strides = [1, 1]} : vector<16x512xf32> to vector<16x128xf32>
    %41 = arith.negf %40 : vector<16x128xf32>
    %42 = math.exp %41 : vector<16x128xf32>
    %cst_24 = arith.constant 1.000000e+00 : f32
    %43 = vector.broadcast %cst_24 : f32 to vector<16x128xf32>
    %44 = arith.addf %43, %42 : vector<16x128xf32>
    %45 = arith.divf %43, %44 : vector<16x128xf32>
    %46 = arith.mulf %37, %16 : vector<16x128xf32>
    %47 = arith.mulf %31, %39 : vector<16x128xf32>
    %48 = arith.addf %46, %47 : vector<16x128xf32>
    %49 = math.tanh %48 : vector<16x128xf32>
    %50 = arith.mulf %45, %49 : vector<16x128xf32>
    %51 = arith.addi %14, %c0_i32_17 : i32
    %52 = vector.broadcast %51 : i32 to vector<16x1xi32>
    %53 = arith.cmpi eq, %13, %52 : vector<16x1xi32>
    %54 = vector.shape_cast %53 : vector<16x1xi1> to vector<16x1xi1>
    %55 = vector.broadcast %54 : vector<16x1xi1> to vector<16x128xi1>
    %56 = arith.select %55, %50, %17 : vector<16x128xi1>, vector<16x128xf32>
    %c1_i32_25 = arith.constant 1 : i32
    %c16_i32_26 = arith.constant 16 : i32
    %57 = arith.muli %c1_i32_25, %c16_i32_26 : i32
    %58 = tpu.assume_multiple %57, 16 : i32
    %59 = arith.index_cast %58 : i32 to index
    %c0_27 = arith.constant 0 : index
    %60 = vector.load %arg8[%59, %c0_27] : memref<128x512xf32, #tpu.memory_space<vmem>>, vector<16x512xf32>
    %61 = arith.truncf %50 : vector<16x128xf32> to vector<16x128xbf16>
    %c0_28 = arith.constant 0 : index
    %c0_29 = arith.constant 0 : index
    %62 = vector.load %arg4[%c0_28, %c0_29] : memref<128x512xbf16, #tpu.memory_space<vmem>>, vector<128x512xbf16>
    %cst_30 = arith.constant dense<0.000000e+00> : vector<16x512xf32>
    %63 = tpu.matmul %61, %62, %cst_30 {dimension_numbers = #tpu.dot_dimension_numbers<[1], [0], [0], [1], [0, 0, 1, 1], [], []>} : vector<16x128xbf16>, vector<128x512xbf16>, vector<16x512xf32> -> vector<16x512xf32>
    %64 = arith.addf %60, %63 : vector<16x512xf32>
    %65 = vector.extract_strided_slice %64 {offsets = [0, 0], sizes = [16, 128], strides = [1, 1]} : vector<16x512xf32> to vector<16x128xf32>
    %66 = arith.negf %65 : vector<16x128xf32>
    %67 = math.exp %66 : vector<16x128xf32>
    %cst_31 = arith.constant 1.000000e+00 : f32
    %68 = vector.broadcast %cst_31 : f32 to vector<16x128xf32>
    %69 = arith.addf %68, %67 : vector<16x128xf32>
    %70 = arith.divf %68, %69 : vector<16x128xf32>
    %71 = vector.extract_strided_slice %64 {offsets = [0, 128], sizes = [16, 128], strides = [1, 1]} : vector<16x512xf32> to vector<16x128xf32>
    %72 = arith.negf %71 : vector<16x128xf32>
    %73 = math.exp %72 : vector<16x128xf32>
    %cst_32 = arith.constant 1.000000e+00 : f32
    %74 = vector.broadcast %cst_32 : f32 to vector<16x128xf32>
    %75 = arith.addf %74, %73 : vector<16x128xf32>
    %76 = arith.divf %74, %75 : vector<16x128xf32>
    %77 = vector.extract_strided_slice %64 {offsets = [0, 256], sizes = [16, 128], strides = [1, 1]} : vector<16x512xf32> to vector<16x128xf32>
    %78 = math.tanh %77 : vector<16x128xf32>
    %79 = vector.extract_strided_slice %64 {offsets = [0, 384], sizes = [16, 128], strides = [1, 1]} : vector<16x512xf32> to vector<16x128xf32>
    %80 = arith.negf %79 : vector<16x128xf32>
    %81 = math.exp %80 : vector<16x128xf32>
    %cst_33 = arith.constant 1.000000e+00 : f32
    %82 = vector.broadcast %cst_33 : f32 to vector<16x128xf32>
    %83 = arith.addf %82, %81 : vector<16x128xf32>
    %84 = arith.divf %82, %83 : vector<16x128xf32>
    %85 = arith.mulf %76, %48 : vector<16x128xf32>
    %86 = arith.mulf %70, %78 : vector<16x128xf32>
    %87 = arith.addf %85, %86 : vector<16x128xf32>
    %88 = math.tanh %87 : vector<16x128xf32>
    %89 = arith.mulf %84, %88 : vector<16x128xf32>
    %90 = arith.addi %14, %c1_i32_25 : i32
    %91 = vector.broadcast %90 : i32 to vector<16x1xi32>
    %92 = arith.cmpi eq, %13, %91 : vector<16x1xi32>
    %93 = vector.shape_cast %92 : vector<16x1xi1> to vector<16x1xi1>
    %94 = vector.broadcast %93 : vector<16x1xi1> to vector<16x128xi1>
    %95 = arith.select %94, %89, %56 : vector<16x128xi1>, vector<16x128xf32>
    %c2_i32 = arith.constant 2 : i32
    %c16_i32_34 = arith.constant 16 : i32
    %96 = arith.muli %c2_i32, %c16_i32_34 : i32
    %97 = tpu.assume_multiple %96, 16 : i32
    %98 = arith.index_cast %97 : i32 to index
    %c0_35 = arith.constant 0 : index
    %99 = vector.load %arg8[%98, %c0_35] : memref<128x512xf32, #tpu.memory_space<vmem>>, vector<16x512xf32>
    %100 = arith.truncf %89 : vector<16x128xf32> to vector<16x128xbf16>
    %c0_36 = arith.constant 0 : index
    %c0_37 = arith.constant 0 : index
    %101 = vector.load %arg4[%c0_36, %c0_37] : memref<128x512xbf16, #tpu.memory_space<vmem>>, vector<128x512xbf16>
    %cst_38 = arith.constant dense<0.000000e+00> : vector<16x512xf32>
    %102 = tpu.matmul %100, %101, %cst_38 {dimension_numbers = #tpu.dot_dimension_numbers<[1], [0], [0], [1], [0, 0, 1, 1], [], []>} : vector<16x128xbf16>, vector<128x512xbf16>, vector<16x512xf32> -> vector<16x512xf32>
    %103 = arith.addf %99, %102 : vector<16x512xf32>
    %104 = vector.extract_strided_slice %103 {offsets = [0, 0], sizes = [16, 128], strides = [1, 1]} : vector<16x512xf32> to vector<16x128xf32>
    %105 = arith.negf %104 : vector<16x128xf32>
    %106 = math.exp %105 : vector<16x128xf32>
    %cst_39 = arith.constant 1.000000e+00 : f32
    %107 = vector.broadcast %cst_39 : f32 to vector<16x128xf32>
    %108 = arith.addf %107, %106 : vector<16x128xf32>
    %109 = arith.divf %107, %108 : vector<16x128xf32>
    %110 = vector.extract_strided_slice %103 {offsets = [0, 128], sizes = [16, 128], strides = [1, 1]} : vector<16x512xf32> to vector<16x128xf32>
    %111 = arith.negf %110 : vector<16x128xf32>
    %112 = math.exp %111 : vector<16x128xf32>
    %cst_40 = arith.constant 1.000000e+00 : f32
    %113 = vector.broadcast %cst_40 : f32 to vector<16x128xf32>
    %114 = arith.addf %113, %112 : vector<16x128xf32>
    %115 = arith.divf %113, %114 : vector<16x128xf32>
    %116 = vector.extract_strided_slice %103 {offsets = [0, 256], sizes = [16, 128], strides = [1, 1]} : vector<16x512xf32> to vector<16x128xf32>
    %117 = math.tanh %116 : vector<16x128xf32>
    %118 = vector.extract_strided_slice %103 {offsets = [0, 384], sizes = [16, 128], strides = [1, 1]} : vector<16x512xf32> to vector<16x128xf32>
    %119 = arith.negf %118 : vector<16x128xf32>
    %120 = math.exp %119 : vector<16x128xf32>
    %cst_41 = arith.constant 1.000000e+00 : f32
    %121 = vector.broadcast %cst_41 : f32 to vector<16x128xf32>
    %122 = arith.addf %121, %120 : vector<16x128xf32>
    %123 = arith.divf %121, %122 : vector<16x128xf32>
    %124 = arith.mulf %115, %87 : vector<16x128xf32>
    %125 = arith.mulf %109, %117 : vector<16x128xf32>
    %126 = arith.addf %124, %125 : vector<16x128xf32>
    %127 = math.tanh %126 : vector<16x128xf32>
    %128 = arith.mulf %123, %127 : vector<16x128xf32>
    %129 = arith.addi %14, %c2_i32 : i32
    %130 = vector.broadcast %129 : i32 to vector<16x1xi32>
    %131 = arith.cmpi eq, %13, %130 : vector<16x1xi32>
    %132 = vector.shape_cast %131 : vector<16x1xi1> to vector<16x1xi1>
    %133 = vector.broadcast %132 : vector<16x1xi1> to vector<16x128xi1>
    %134 = arith.select %133, %128, %95 : vector<16x128xi1>, vector<16x128xf32>
    %c3_i32 = arith.constant 3 : i32
    %c16_i32_42 = arith.constant 16 : i32
    %135 = arith.muli %c3_i32, %c16_i32_42 : i32
    %136 = tpu.assume_multiple %135, 16 : i32
    %137 = arith.index_cast %136 : i32 to index
    %c0_43 = arith.constant 0 : index
    %138 = vector.load %arg8[%137, %c0_43] : memref<128x512xf32, #tpu.memory_space<vmem>>, vector<16x512xf32>
    %139 = arith.truncf %128 : vector<16x128xf32> to vector<16x128xbf16>
    %c0_44 = arith.constant 0 : index
    %c0_45 = arith.constant 0 : index
    %140 = vector.load %arg4[%c0_44, %c0_45] : memref<128x512xbf16, #tpu.memory_space<vmem>>, vector<128x512xbf16>
    %cst_46 = arith.constant dense<0.000000e+00> : vector<16x512xf32>
    %141 = tpu.matmul %139, %140, %cst_46 {dimension_numbers = #tpu.dot_dimension_numbers<[1], [0], [0], [1], [0, 0, 1, 1], [], []>} : vector<16x128xbf16>, vector<128x512xbf16>, vector<16x512xf32> -> vector<16x512xf32>
    %142 = arith.addf %138, %141 : vector<16x512xf32>
    %143 = vector.extract_strided_slice %142 {offsets = [0, 0], sizes = [16, 128], strides = [1, 1]} : vector<16x512xf32> to vector<16x128xf32>
    %144 = arith.negf %143 : vector<16x128xf32>
    %145 = math.exp %144 : vector<16x128xf32>
    %cst_47 = arith.constant 1.000000e+00 : f32
    %146 = vector.broadcast %cst_47 : f32 to vector<16x128xf32>
    %147 = arith.addf %146, %145 : vector<16x128xf32>
    %148 = arith.divf %146, %147 : vector<16x128xf32>
    %149 = vector.extract_strided_slice %142 {offsets = [0, 128], sizes = [16, 128], strides = [1, 1]} : vector<16x512xf32> to vector<16x128xf32>
    %150 = arith.negf %149 : vector<16x128xf32>
    %151 = math.exp %150 : vector<16x128xf32>
    %cst_48 = arith.constant 1.000000e+00 : f32
    %152 = vector.broadcast %cst_48 : f32 to vector<16x128xf32>
    %153 = arith.addf %152, %151 : vector<16x128xf32>
    %154 = arith.divf %152, %153 : vector<16x128xf32>
    %155 = vector.extract_strided_slice %142 {offsets = [0, 256], sizes = [16, 128], strides = [1, 1]} : vector<16x512xf32> to vector<16x128xf32>
    %156 = math.tanh %155 : vector<16x128xf32>
    %157 = vector.extract_strided_slice %142 {offsets = [0, 384], sizes = [16, 128], strides = [1, 1]} : vector<16x512xf32> to vector<16x128xf32>
    %158 = arith.negf %157 : vector<16x128xf32>
    %159 = math.exp %158 : vector<16x128xf32>
    %cst_49 = arith.constant 1.000000e+00 : f32
    %160 = vector.broadcast %cst_49 : f32 to vector<16x128xf32>
    %161 = arith.addf %160, %159 : vector<16x128xf32>
    %162 = arith.divf %160, %161 : vector<16x128xf32>
    %163 = arith.mulf %154, %126 : vector<16x128xf32>
    %164 = arith.mulf %148, %156 : vector<16x128xf32>
    %165 = arith.addf %163, %164 : vector<16x128xf32>
    %166 = math.tanh %165 : vector<16x128xf32>
    %167 = arith.mulf %162, %166 : vector<16x128xf32>
    %168 = arith.addi %14, %c3_i32 : i32
    %169 = vector.broadcast %168 : i32 to vector<16x1xi32>
    %170 = arith.cmpi eq, %13, %169 : vector<16x1xi32>
    %171 = vector.shape_cast %170 : vector<16x1xi1> to vector<16x1xi1>
    %172 = vector.broadcast %171 : vector<16x1xi1> to vector<16x128xi1>
    %173 = arith.select %172, %167, %134 : vector<16x128xi1>, vector<16x128xf32>
    %c4_i32 = arith.constant 4 : i32
    %c16_i32_50 = arith.constant 16 : i32
    %174 = arith.muli %c4_i32, %c16_i32_50 : i32
    %175 = tpu.assume_multiple %174, 16 : i32
    %176 = arith.index_cast %175 : i32 to index
    %c0_51 = arith.constant 0 : index
    %177 = vector.load %arg8[%176, %c0_51] : memref<128x512xf32, #tpu.memory_space<vmem>>, vector<16x512xf32>
    %178 = arith.truncf %167 : vector<16x128xf32> to vector<16x128xbf16>
    %c0_52 = arith.constant 0 : index
    %c0_53 = arith.constant 0 : index
    %179 = vector.load %arg4[%c0_52, %c0_53] : memref<128x512xbf16, #tpu.memory_space<vmem>>, vector<128x512xbf16>
    %cst_54 = arith.constant dense<0.000000e+00> : vector<16x512xf32>
    %180 = tpu.matmul %178, %179, %cst_54 {dimension_numbers = #tpu.dot_dimension_numbers<[1], [0], [0], [1], [0, 0, 1, 1], [], []>} : vector<16x128xbf16>, vector<128x512xbf16>, vector<16x512xf32> -> vector<16x512xf32>
    %181 = arith.addf %177, %180 : vector<16x512xf32>
    %182 = vector.extract_strided_slice %181 {offsets = [0, 0], sizes = [16, 128], strides = [1, 1]} : vector<16x512xf32> to vector<16x128xf32>
    %183 = arith.negf %182 : vector<16x128xf32>
    %184 = math.exp %183 : vector<16x128xf32>
    %cst_55 = arith.constant 1.000000e+00 : f32
    %185 = vector.broadcast %cst_55 : f32 to vector<16x128xf32>
    %186 = arith.addf %185, %184 : vector<16x128xf32>
    %187 = arith.divf %185, %186 : vector<16x128xf32>
    %188 = vector.extract_strided_slice %181 {offsets = [0, 128], sizes = [16, 128], strides = [1, 1]} : vector<16x512xf32> to vector<16x128xf32>
    %189 = arith.negf %188 : vector<16x128xf32>
    %190 = math.exp %189 : vector<16x128xf32>
    %cst_56 = arith.constant 1.000000e+00 : f32
    %191 = vector.broadcast %cst_56 : f32 to vector<16x128xf32>
    %192 = arith.addf %191, %190 : vector<16x128xf32>
    %193 = arith.divf %191, %192 : vector<16x128xf32>
    %194 = vector.extract_strided_slice %181 {offsets = [0, 256], sizes = [16, 128], strides = [1, 1]} : vector<16x512xf32> to vector<16x128xf32>
    %195 = math.tanh %194 : vector<16x128xf32>
    %196 = vector.extract_strided_slice %181 {offsets = [0, 384], sizes = [16, 128], strides = [1, 1]} : vector<16x512xf32> to vector<16x128xf32>
    %197 = arith.negf %196 : vector<16x128xf32>
    %198 = math.exp %197 : vector<16x128xf32>
    %cst_57 = arith.constant 1.000000e+00 : f32
    %199 = vector.broadcast %cst_57 : f32 to vector<16x128xf32>
    %200 = arith.addf %199, %198 : vector<16x128xf32>
    %201 = arith.divf %199, %200 : vector<16x128xf32>
    %202 = arith.mulf %193, %165 : vector<16x128xf32>
    %203 = arith.mulf %187, %195 : vector<16x128xf32>
    %204 = arith.addf %202, %203 : vector<16x128xf32>
    %205 = math.tanh %204 : vector<16x128xf32>
    %206 = arith.mulf %201, %205 : vector<16x128xf32>
    %207 = arith.addi %14, %c4_i32 : i32
    %208 = vector.broadcast %207 : i32 to vector<16x1xi32>
    %209 = arith.cmpi eq, %13, %208 : vector<16x1xi32>
    %210 = vector.shape_cast %209 : vector<16x1xi1> to vector<16x1xi1>
    %211 = vector.broadcast %210 : vector<16x1xi1> to vector<16x128xi1>
    %212 = arith.select %211, %206, %173 : vector<16x128xi1>, vector<16x128xf32>
    %c5_i32 = arith.constant 5 : i32
    %c16_i32_58 = arith.constant 16 : i32
    %213 = arith.muli %c5_i32, %c16_i32_58 : i32
    %214 = tpu.assume_multiple %213, 16 : i32
    %215 = arith.index_cast %214 : i32 to index
    %c0_59 = arith.constant 0 : index
    %216 = vector.load %arg8[%215, %c0_59] : memref<128x512xf32, #tpu.memory_space<vmem>>, vector<16x512xf32>
    %217 = arith.truncf %206 : vector<16x128xf32> to vector<16x128xbf16>
    %c0_60 = arith.constant 0 : index
    %c0_61 = arith.constant 0 : index
    %218 = vector.load %arg4[%c0_60, %c0_61] : memref<128x512xbf16, #tpu.memory_space<vmem>>, vector<128x512xbf16>
    %cst_62 = arith.constant dense<0.000000e+00> : vector<16x512xf32>
    %219 = tpu.matmul %217, %218, %cst_62 {dimension_numbers = #tpu.dot_dimension_numbers<[1], [0], [0], [1], [0, 0, 1, 1], [], []>} : vector<16x128xbf16>, vector<128x512xbf16>, vector<16x512xf32> -> vector<16x512xf32>
    %220 = arith.addf %216, %219 : vector<16x512xf32>
    %221 = vector.extract_strided_slice %220 {offsets = [0, 0], sizes = [16, 128], strides = [1, 1]} : vector<16x512xf32> to vector<16x128xf32>
    %222 = arith.negf %221 : vector<16x128xf32>
    %223 = math.exp %222 : vector<16x128xf32>
    %cst_63 = arith.constant 1.000000e+00 : f32
    %224 = vector.broadcast %cst_63 : f32 to vector<16x128xf32>
    %225 = arith.addf %224, %223 : vector<16x128xf32>
    %226 = arith.divf %224, %225 : vector<16x128xf32>
    %227 = vector.extract_strided_slice %220 {offsets = [0, 128], sizes = [16, 128], strides = [1, 1]} : vector<16x512xf32> to vector<16x128xf32>
    %228 = arith.negf %227 : vector<16x128xf32>
    %229 = math.exp %228 : vector<16x128xf32>
    %cst_64 = arith.constant 1.000000e+00 : f32
    %230 = vector.broadcast %cst_64 : f32 to vector<16x128xf32>
    %231 = arith.addf %230, %229 : vector<16x128xf32>
    %232 = arith.divf %230, %231 : vector<16x128xf32>
    %233 = vector.extract_strided_slice %220 {offsets = [0, 256], sizes = [16, 128], strides = [1, 1]} : vector<16x512xf32> to vector<16x128xf32>
    %234 = math.tanh %233 : vector<16x128xf32>
    %235 = vector.extract_strided_slice %220 {offsets = [0, 384], sizes = [16, 128], strides = [1, 1]} : vector<16x512xf32> to vector<16x128xf32>
    %236 = arith.negf %235 : vector<16x128xf32>
    %237 = math.exp %236 : vector<16x128xf32>
    %cst_65 = arith.constant 1.000000e+00 : f32
    %238 = vector.broadcast %cst_65 : f32 to vector<16x128xf32>
    %239 = arith.addf %238, %237 : vector<16x128xf32>
    %240 = arith.divf %238, %239 : vector<16x128xf32>
    %241 = arith.mulf %232, %204 : vector<16x128xf32>
    %242 = arith.mulf %226, %234 : vector<16x128xf32>
    %243 = arith.addf %241, %242 : vector<16x128xf32>
    %244 = math.tanh %243 : vector<16x128xf32>
    %245 = arith.mulf %240, %244 : vector<16x128xf32>
    %246 = arith.addi %14, %c5_i32 : i32
    %247 = vector.broadcast %246 : i32 to vector<16x1xi32>
    %248 = arith.cmpi eq, %13, %247 : vector<16x1xi32>
    %249 = vector.shape_cast %248 : vector<16x1xi1> to vector<16x1xi1>
    %250 = vector.broadcast %249 : vector<16x1xi1> to vector<16x128xi1>
    %251 = arith.select %250, %245, %212 : vector<16x128xi1>, vector<16x128xf32>
    %c6_i32 = arith.constant 6 : i32
    %c16_i32_66 = arith.constant 16 : i32
    %252 = arith.muli %c6_i32, %c16_i32_66 : i32
    %253 = tpu.assume_multiple %252, 16 : i32
    %254 = arith.index_cast %253 : i32 to index
    %c0_67 = arith.constant 0 : index
    %255 = vector.load %arg8[%254, %c0_67] : memref<128x512xf32, #tpu.memory_space<vmem>>, vector<16x512xf32>
    %256 = arith.truncf %245 : vector<16x128xf32> to vector<16x128xbf16>
    %c0_68 = arith.constant 0 : index
    %c0_69 = arith.constant 0 : index
    %257 = vector.load %arg4[%c0_68, %c0_69] : memref<128x512xbf16, #tpu.memory_space<vmem>>, vector<128x512xbf16>
    %cst_70 = arith.constant dense<0.000000e+00> : vector<16x512xf32>
    %258 = tpu.matmul %256, %257, %cst_70 {dimension_numbers = #tpu.dot_dimension_numbers<[1], [0], [0], [1], [0, 0, 1, 1], [], []>} : vector<16x128xbf16>, vector<128x512xbf16>, vector<16x512xf32> -> vector<16x512xf32>
    %259 = arith.addf %255, %258 : vector<16x512xf32>
    %260 = vector.extract_strided_slice %259 {offsets = [0, 0], sizes = [16, 128], strides = [1, 1]} : vector<16x512xf32> to vector<16x128xf32>
    %261 = arith.negf %260 : vector<16x128xf32>
    %262 = math.exp %261 : vector<16x128xf32>
    %cst_71 = arith.constant 1.000000e+00 : f32
    %263 = vector.broadcast %cst_71 : f32 to vector<16x128xf32>
    %264 = arith.addf %263, %262 : vector<16x128xf32>
    %265 = arith.divf %263, %264 : vector<16x128xf32>
    %266 = vector.extract_strided_slice %259 {offsets = [0, 128], sizes = [16, 128], strides = [1, 1]} : vector<16x512xf32> to vector<16x128xf32>
    %267 = arith.negf %266 : vector<16x128xf32>
    %268 = math.exp %267 : vector<16x128xf32>
    %cst_72 = arith.constant 1.000000e+00 : f32
    %269 = vector.broadcast %cst_72 : f32 to vector<16x128xf32>
    %270 = arith.addf %269, %268 : vector<16x128xf32>
    %271 = arith.divf %269, %270 : vector<16x128xf32>
    %272 = vector.extract_strided_slice %259 {offsets = [0, 256], sizes = [16, 128], strides = [1, 1]} : vector<16x512xf32> to vector<16x128xf32>
    %273 = math.tanh %272 : vector<16x128xf32>
    %274 = vector.extract_strided_slice %259 {offsets = [0, 384], sizes = [16, 128], strides = [1, 1]} : vector<16x512xf32> to vector<16x128xf32>
    %275 = arith.negf %274 : vector<16x128xf32>
    %276 = math.exp %275 : vector<16x128xf32>
    %cst_73 = arith.constant 1.000000e+00 : f32
    %277 = vector.broadcast %cst_73 : f32 to vector<16x128xf32>
    %278 = arith.addf %277, %276 : vector<16x128xf32>
    %279 = arith.divf %277, %278 : vector<16x128xf32>
    %280 = arith.mulf %271, %243 : vector<16x128xf32>
    %281 = arith.mulf %265, %273 : vector<16x128xf32>
    %282 = arith.addf %280, %281 : vector<16x128xf32>
    %283 = math.tanh %282 : vector<16x128xf32>
    %284 = arith.mulf %279, %283 : vector<16x128xf32>
    %285 = arith.addi %14, %c6_i32 : i32
    %286 = vector.broadcast %285 : i32 to vector<16x1xi32>
    %287 = arith.cmpi eq, %13, %286 : vector<16x1xi32>
    %288 = vector.shape_cast %287 : vector<16x1xi1> to vector<16x1xi1>
    %289 = vector.broadcast %288 : vector<16x1xi1> to vector<16x128xi1>
    %290 = arith.select %289, %284, %251 : vector<16x128xi1>, vector<16x128xf32>
    %c7_i32 = arith.constant 7 : i32
    %c16_i32_74 = arith.constant 16 : i32
    %291 = arith.muli %c7_i32, %c16_i32_74 : i32
    %292 = tpu.assume_multiple %291, 16 : i32
    %293 = arith.index_cast %292 : i32 to index
    %c0_75 = arith.constant 0 : index
    %294 = vector.load %arg8[%293, %c0_75] : memref<128x512xf32, #tpu.memory_space<vmem>>, vector<16x512xf32>
    %295 = arith.truncf %284 : vector<16x128xf32> to vector<16x128xbf16>
    %c0_76 = arith.constant 0 : index
    %c0_77 = arith.constant 0 : index
    %296 = vector.load %arg4[%c0_76, %c0_77] : memref<128x512xbf16, #tpu.memory_space<vmem>>, vector<128x512xbf16>
    %cst_78 = arith.constant dense<0.000000e+00> : vector<16x512xf32>
    %297 = tpu.matmul %295, %296, %cst_78 {dimension_numbers = #tpu.dot_dimension_numbers<[1], [0], [0], [1], [0, 0, 1, 1], [], []>} : vector<16x128xbf16>, vector<128x512xbf16>, vector<16x512xf32> -> vector<16x512xf32>
    %298 = arith.addf %294, %297 : vector<16x512xf32>
    %299 = vector.extract_strided_slice %298 {offsets = [0, 0], sizes = [16, 128], strides = [1, 1]} : vector<16x512xf32> to vector<16x128xf32>
    %300 = arith.negf %299 : vector<16x128xf32>
    %301 = math.exp %300 : vector<16x128xf32>
    %cst_79 = arith.constant 1.000000e+00 : f32
    %302 = vector.broadcast %cst_79 : f32 to vector<16x128xf32>
    %303 = arith.addf %302, %301 : vector<16x128xf32>
    %304 = arith.divf %302, %303 : vector<16x128xf32>
    %305 = vector.extract_strided_slice %298 {offsets = [0, 128], sizes = [16, 128], strides = [1, 1]} : vector<16x512xf32> to vector<16x128xf32>
    %306 = arith.negf %305 : vector<16x128xf32>
    %307 = math.exp %306 : vector<16x128xf32>
    %cst_80 = arith.constant 1.000000e+00 : f32
    %308 = vector.broadcast %cst_80 : f32 to vector<16x128xf32>
    %309 = arith.addf %308, %307 : vector<16x128xf32>
    %310 = arith.divf %308, %309 : vector<16x128xf32>
    %311 = vector.extract_strided_slice %298 {offsets = [0, 256], sizes = [16, 128], strides = [1, 1]} : vector<16x512xf32> to vector<16x128xf32>
    %312 = math.tanh %311 : vector<16x128xf32>
    %313 = vector.extract_strided_slice %298 {offsets = [0, 384], sizes = [16, 128], strides = [1, 1]} : vector<16x512xf32> to vector<16x128xf32>
    %314 = arith.negf %313 : vector<16x128xf32>
    %315 = math.exp %314 : vector<16x128xf32>
    %cst_81 = arith.constant 1.000000e+00 : f32
    %316 = vector.broadcast %cst_81 : f32 to vector<16x128xf32>
    %317 = arith.addf %316, %315 : vector<16x128xf32>
    %318 = arith.divf %316, %317 : vector<16x128xf32>
    %319 = arith.mulf %310, %282 : vector<16x128xf32>
    %320 = arith.mulf %304, %312 : vector<16x128xf32>
    %321 = arith.addf %319, %320 : vector<16x128xf32>
    %322 = math.tanh %321 : vector<16x128xf32>
    %323 = arith.mulf %318, %322 : vector<16x128xf32>
    %324 = arith.addi %14, %c7_i32 : i32
    %325 = vector.broadcast %324 : i32 to vector<16x1xi32>
    %326 = arith.cmpi eq, %13, %325 : vector<16x1xi32>
    %327 = vector.shape_cast %326 : vector<16x1xi1> to vector<16x1xi1>
    %328 = vector.broadcast %327 : vector<16x1xi1> to vector<16x128xi1>
    %329 = arith.select %328, %323, %290 : vector<16x128xi1>, vector<16x128xf32>
    %c8_i32_82 = arith.constant 8 : i32
    %c0_83 = arith.constant 0 : index
    %c0_84 = arith.constant 0 : index
    %330 = vector.load %arg9[%c0_83, %c0_84] : memref<16x128xf32, #tpu.memory_space<vmem>>, vector<16x128xf32>
    tpu.vector_store %arg9[%c0_83, %c0_84], %323 {strides = array<i32>} : memref<16x128xf32, #tpu.memory_space<vmem>>, vector<16x128xf32>,
    %c0_85 = arith.constant 0 : index
    %c0_86 = arith.constant 0 : index
    %331 = vector.load %arg10[%c0_85, %c0_86] : memref<16x128xf32, #tpu.memory_space<vmem>>, vector<16x128xf32>
    tpu.vector_store %arg10[%c0_85, %c0_86], %321 {strides = array<i32>} : memref<16x128xf32, #tpu.memory_space<vmem>>, vector<16x128xf32>,
    %c0_87 = arith.constant 0 : index
    %c0_88 = arith.constant 0 : index
    %332 = vector.load %arg11[%c0_87, %c0_88] : memref<16x128xf32, #tpu.memory_space<vmem>>, vector<16x128xf32>
    tpu.vector_store %arg11[%c0_87, %c0_88], %329 {strides = array<i32>} : memref<16x128xf32, #tpu.memory_space<vmem>>, vector<16x128xf32>,
    %c0_i32_89 = arith.constant 0 : i32
    %333 = arith.cmpi eq, %arg1, %c0_i32_89 : i32
    %334 = arith.extui %333 : i1 to i32
    %c0_i32_90 = arith.constant 0 : i32
    %335 = arith.cmpi ne, %334, %c0_i32_90 : i32
    scf.if %335 {
      %c0_91 = arith.constant 0 : index
      %c0_92 = arith.constant 0 : index
      %336 = vector.load %arg11[%c0_91, %c0_92] : memref<16x128xf32, #tpu.memory_space<vmem>>, vector<16x128xf32>
      %c0_93 = arith.constant 0 : index
      %c0_94 = arith.constant 0 : index
      %337 = vector.load %arg7[%c0_93, %c0_94] : memref<16x128xf32, #tpu.memory_space<vmem>>, vector<16x128xf32>
      tpu.vector_store %arg7[%c0_93, %c0_94], %336 {strides = array<i32>} : memref<16x128xf32, #tpu.memory_space<vmem>>, vector<16x128xf32>,
    } else {
    }
    return
  }
  func.func @transform_0(%arg0: i32, %arg1: i32) -> (i32, i32, i32) {
    %c0_i32 = arith.constant 0 : i32
    %c0_i32_0 = arith.constant 0 : i32
    return %arg0, %arg1, %c0_i32 : i32, i32, i32
  }
  func.func @transform_1(%arg0: i32, %arg1: i32) -> (i32, i32) {
    %c0_i32 = arith.constant 0 : i32
    %c0_i32_0 = arith.constant 0 : i32
    %c0_i32_1 = arith.constant 0 : i32
    return %c0_i32, %c0_i32_0 : i32, i32
  }
  func.func @transform_2(%arg0: i32, %arg1: i32) -> (i32, i32) {
    %c0_i32 = arith.constant 0 : i32
    %c0_i32_0 = arith.constant 0 : i32
    %c0_i32_1 = arith.constant 0 : i32
    return %c0_i32, %c0_i32_0 : i32, i32
  }
  func.func @transform_3(%arg0: i32, %arg1: i32) -> (i32, i32) {
    %c0_i32 = arith.constant 0 : i32
    %c0_i32_0 = arith.constant 0 : i32
    %c0_i32_1 = arith.constant 0 : i32
    return %c0_i32, %c0_i32_0 : i32, i32
  }
  func.func @transform_4(%arg0: i32, %arg1: i32) -> (i32, i32) {
    %c0_i32 = arith.constant 0 : i32
    %c0_i32_0 = arith.constant 0 : i32
    return %arg0, %c0_i32 : i32, i32
  }
  func.func @transform_5(%arg0: i32, %arg1: i32) -> (i32, i32) {
    %c0_i32 = arith.constant 0 : i32
    %c0_i32_0 = arith.constant 0 : i32
    return %arg0, %c0_i32 : i32, i32
  }
}

</mosaic_0001>

<bundles_post_ra>
// kernel: tpu_custom_call.1
= control target key start
LH: loop header
LB: loop body
LE: loop exit
PB: predicated region body
PF: predicated region fallthrough
CT: control target
= control target key end

     0   :  { %10 = vsyncpa [#allocation7], 0  ;;  %s3736_s0 = inlined_call_operand.hbm [shape: bf16[1,128,128], index: 0, kind: input, shape index: {}]   ;;  %s3737_s1 = inlined_call_operand.hbm [shape: bf16[128,512], index: 1, kind: input, shape index: {}]   ;;  %s3738_s2 = inlined_call_operand.hbm [shape: bf16[128,512], index: 2, kind: input, shape index: {}]   ;;  %s3739_s3 = inlined_call_operand.vmem [shape: f32[1,512], index: 3, kind: input, shape index: {}]   ;;  %s3740_s4 = inlined_call_operand.vmem [shape: s32[16,1], index: 4, kind: input, shape index: {}]   ;;  %s3741_s5 = inlined_call_operand.hbm [shape: f32[16,128], index: 5, kind: output, shape index: {}]  }
   0x1   :  { %11 = vsyncpa [#allocation10], 0 }
   0x2   :  { %12 = vsyncpa [#allocation8], 0  ;;  %s2855_s18 = smov [#allocation9]  }
   0x3   :  { %s30_s19 = sshll.u32 %s2855_s18, 4  ;;  %s31_s19 = int_to_ptr.vmem [resolvable:$true] %s30_s19 }
   0x4   :  { %s2777_s20 = scalar_lea.vmem %s31_s19, 4096  ;;  %p2782_p1 = scmp.lt.s32.totalorder %s31_s19, %s31_s19 }
   0x5   :  { %p2778_p0 = scmp.ne.s32.totalorder %s31_s19, %s2777_s20  ;;  %p2783_p2 = scmp.lt.s32.totalorder %s2777_s20, %s2777_s20 }
   0x7   :  { %p2784_p3 = por %p2783_p2, %p2782_p1 }
   0x9   :  { %p2785_p4 = pnand %p2784_p3, %p2778_p0 }
   0xb   :  { %2788 = shalt.err (!%p2785_p4)
}
   0xc   :  { %s2856_s21 = smov 256   ;;  %s2857_s22 = smov 16  }
   0xd   :  { %36 = dma.hbm_to_vmem [thread:$0]  %s3737_s1, 4096, %s31_s19, [#allocation10], %s2856_s21, %s2856_s21, %s2857_s22  }
   0xe   :  { %s2858_s25 = smov [#allocation6]  }
   0xf   :  { %s18_s26 = sshll.u32 %s2858_s25, 4  ;;  %s19_s26 = int_to_ptr.vmem [resolvable:$true] %s18_s26 }
  0x10   :  { %s2797_s27 = scalar_lea.vmem %s19_s26, 1024  ;;  %p2802_p6 = scmp.lt.s32.totalorder %s19_s26, %s19_s26 }
  0x11   :  { %p2798_p5 = scmp.ne.s32.totalorder %s19_s26, %s2797_s27  ;;  %p2803_p7 = scmp.lt.s32.totalorder %s2797_s27, %s2797_s27 }
  0x13   :  { %p2804_p8 = por %p2803_p7, %p2802_p6 }
  0x15   :  { %p2805_p9 = pnand %p2804_p8, %p2798_p5 }
  0x17   :  { %2808 = shalt.err (!%p2805_p9)
}
  0x18   :  { %s2859_s28 = smov 64   ;;  %s2860_s29 = smov 4  }
  0x19   :  { %24 = dma.hbm_to_vmem [thread:$0]  %s3736_s0, 1024, %s19_s26, [#allocation7], %s2859_s28, %s2859_s28, %s2860_s29  }
  0x1a   :  { %s2861_s7 = smov [#allocation11]  }
  0x1b   :  { %s42_s8 = sshll.u32 %s2861_s7, 4  ;;  %s43_s8 = int_to_ptr.vmem [resolvable:$true] %s42_s8 }
  0x1c   :  { %s2817_s1 = scalar_lea.vmem %s43_s8, 4096  ;;  %p2822_p11 = scmp.lt.s32.totalorder %s43_s8, %s43_s8 }
  0x1d   :  { %p2818_p10 = scmp.ne.s32.totalorder %s43_s8, %s2817_s1  ;;  %p2823_p12 = scmp.lt.s32.totalorder %s2817_s1, %s2817_s1 }
  0x1f   :  { %p2824_p13 = por %p2823_p12, %p2822_p11 }
  0x21   :  { %p2825_p0 = pnand %p2824_p13, %p2818_p10 }
  0x23   :  { %2828 = shalt.err (!%p2825_p0)
}
  0x24   :  { %48 = dma.hbm_to_vmem [thread:$0]  %s3738_s2, 4096, %s43_s8, [#allocation10], %s2856_s21, %s2856_s21, %s2857_s22  }
  0x25   :  { %2849 = dma.done.wait [#allocation7], 1024  }
  0x26   :  { %2850 = vsyncadd [#allocation7], 4294966272 }
  0x27   :  { %2851 = dma.done.wait [#allocation10], 8192  }
  0x28   :  { %2852 = vsyncadd [#allocation10], 4294959104  ;;  %v3742_v0 = vmov 0   ;;  %v2377_v1 = vld [vmem:[#allocation9 + $0xe4] ss:$16 sps:$4 sm:$0xff]   ;;  %v2429_v43 = vld [vmem:[#allocation6 + $0x8] sm:$0xff]  }
  0x29   :  { %383 = vmatprep.mubr.bf16.mxu0 %v3742_v0  ;;  %496 = vmatprep.mubr.bf16.mxu1 %v3742_v0  ;;  %v2379_v2 = vld [vmem:[#allocation9 + $0xec] ss:$16 sps:$4 sm:$0xff]   ;;  %v2381_v3 = vld [vmem:[#allocation9 + $0xe0] ss:$16 sps:$4 sm:$0xff]   ;;  %v2382_v4 = vld [vmem:[#allocation9 + $0xe8] ss:$16 sps:$4 sm:$0xff]  }
  0x2a   :  { %2375 = vset.pattern.permute.xlu0 %v3742_v0  ;;  %2376 = vset.pattern.permute.xlu1 %v3742_v0  ;;  %v2383_v5 = vld [vmem:[#allocation9 + $0xc4] ss:$16 sps:$4 sm:$0xff]   ;;  %v2385_v6 = vld [vmem:[#allocation9 + $0xcc] ss:$16 sps:$4 sm:$0xff]   ;;  %v2387_v7 = vld [vmem:[#allocation9 + $0xc0] ss:$16 sps:$4 sm:$0xff]  }
  0x2b   :  { %351 = vmatprep.subr.bf16.mxu0 %v2377_v1  ;;  %464 = vmatprep.subr.bf16.mxu1 %v2379_v2  ;;  %v2388_v8 = vld [vmem:[#allocation9 + $0xc8] ss:$16 sps:$4 sm:$0xff]   ;;  %v2389_v9 = vld [vmem:[#allocation9 + $0xa4] ss:$16 sps:$4 sm:$0xff]   ;;  %v2391_v10 = vld [vmem:[#allocation9 + $0xac] ss:$16 sps:$4 sm:$0xff]  }
  0x2c   :  { %352 = vmatpush1.bf16.msra.mxu0 %v2381_v3  ;;  %465 = vmatpush1.bf16.msra.mxu1 %v2382_v4  ;;  %v2393_v11 = vld [vmem:[#allocation9 + $0xa0] ss:$16 sps:$4 sm:$0xff]   ;;  %v2394_v12 = vld [vmem:[#allocation9 + $0xa8] ss:$16 sps:$4 sm:$0xff]   ;;  %v2395_v13 = vld [vmem:[#allocation9 + $0x84] ss:$16 sps:$4 sm:$0xff]  }
  0x2d   :  { %353 = vmatprep.subr.bf16.mxu0 %v2383_v5  ;;  %466 = vmatprep.subr.bf16.mxu1 %v2385_v6  ;;  %v2397_v14 = vld [vmem:[#allocation9 + $0x8c] ss:$16 sps:$4 sm:$0xff]   ;;  %v2399_v15 = vld [vmem:[#allocation9 + $0x80] ss:$16 sps:$4 sm:$0xff]   ;;  %v2400_v16 = vld [vmem:[#allocation9 + $0x88] ss:$16 sps:$4 sm:$0xff]  }
  0x2e   :  { %v2401_v17 = vld [vmem:[#allocation9 + $0x64] ss:$16 sps:$4 sm:$0xff]   ;;  %v2403_v18 = vld [vmem:[#allocation9 + $0x6c] ss:$16 sps:$4 sm:$0xff]   ;;  %v2405_v19 = vld [vmem:[#allocation9 + $0x60] ss:$16 sps:$4 sm:$0xff]  }
  0x2f   :  { %v2406_v20 = vld [vmem:[#allocation9 + $0x68] ss:$16 sps:$4 sm:$0xff]   ;;  %v2407_v21 = vld [vmem:[#allocation9 + $0x44] ss:$16 sps:$4 sm:$0xff]   ;;  %v2409_v22 = vld [vmem:[#allocation9 + $0x4c] ss:$16 sps:$4 sm:$0xff]  }
  0x30   :  { %354 = vmatpush1.bf16.msra.mxu0 %v2387_v7  ;;  %467 = vmatpush1.bf16.msra.mxu1 %v2388_v8  ;;  %v2411_v23 = vld [vmem:[#allocation9 + $0x40] ss:$16 sps:$4 sm:$0xff]   ;;  %v2412_v24 = vld [vmem:[#allocation9 + $0x48] ss:$16 sps:$4 sm:$0xff]   ;;  %v2413_v25 = vld [vmem:[#allocation9 + $0x24] ss:$16 sps:$4 sm:$0xff]  }
  0x31   :  { %355 = vmatprep.subr.bf16.mxu0 %v2389_v9  ;;  %468 = vmatprep.subr.bf16.mxu1 %v2391_v10  ;;  %v2415_v26 = vld [vmem:[#allocation9 + $0x2c] ss:$16 sps:$4 sm:$0xff]   ;;  %v2417_v27 = vld [vmem:[#allocation9 + $0x20] ss:$16 sps:$4 sm:$0xff]   ;;  %v2418_v28 = vld [vmem:[#allocation9 + $0x28] ss:$16 sps:$4 sm:$0xff]  }
  0x32   :  { %v2419_v29 = vld [vmem:[#allocation9 + $0x4] ss:$16 sps:$4 sm:$0xff]   ;;  %v2421_v30 = vld [vmem:[#allocation9 + $0xc] ss:$16 sps:$4 sm:$0xff]   ;;  %v2423_v31 = vld [vmem:[#allocation9] ss:$16 sps:$4 sm:$0xff]  }
  0x33   :  { %v2424_v32 = vld [vmem:[#allocation9 + $0x8] ss:$16 sps:$4 sm:$0xff]   ;;  %v2910_v33 = vld [vmem:[#allocation11 + $0xe4] ss:$16 sps:$4 sm:$0xff]   ;;  %v2912_v34 = vld [vmem:[#allocation11 + $0xec] ss:$16 sps:$4 sm:$0xff]  }
  0x34   :  { %356 = vmatpush1.bf16.msra.mxu0 %v2393_v11  ;;  %469 = vmatpush1.bf16.msra.mxu1 %v2394_v12  ;;  %v2425_v35 = vld [vmem:[#allocation6] sm:$0xff]   ;;  %v2920_v38 = vld [vmem:[#allocation11 + $0xe8] ss:$16 sps:$4 sm:$0xff]   ;;  %v2922_v39 = vld [vmem:[#allocation11 + $0xcc] ss:$16 sps:$4 sm:$0xff]  }
  0x35   :  { %357 = vmatprep.subr.bf16.mxu0 %v2395_v13  ;;  %470 = vmatprep.subr.bf16.mxu1 %v2397_v14  ;;  %v2914_v36 = vld [vmem:[#allocation11 + $0xe0] ss:$16 sps:$4 sm:$0xff]   ;;  %v2917_v37 = vld [vmem:[#allocation11 + $0xc4] ss:$16 sps:$4 sm:$0xff]   ;;  %v2933_v42 = vld [vmem:[#allocation11 + $0xc8] ss:$16 sps:$4 sm:$0xff]  }
  0x36   :  { %v2926_v40 = vld [vmem:[#allocation11 + $0xc0] ss:$16 sps:$4 sm:$0xff]   ;;  %v2930_v41 = vld [vmem:[#allocation11 + $0xa4] ss:$16 sps:$4 sm:$0xff]   ;;  %v2942_v46 = vld [vmem:[#allocation11 + $0xac] ss:$16 sps:$4 sm:$0xff]  }
  0x37   :  { %v2937_v44 = vld [vmem:[#allocation11 + $0xa0] ss:$16 sps:$4 sm:$0xff]   ;;  %v2939_v45 = vld [vmem:[#allocation11 + $0x84] ss:$16 sps:$4 sm:$0xff]   ;;  %v2945_v47 = vld [vmem:[#allocation11 + $0xa8] ss:$16 sps:$4 sm:$0xff]  }
  0x38   :  { %358 = vmatpush1.bf16.msra.mxu0 %v2399_v15  ;;  %471 = vmatpush1.bf16.msra.mxu1 %v2400_v16  ;;  %v2947_v48 = vld [vmem:[#allocation11 + $0x8c] ss:$16 sps:$4 sm:$0xff]   ;;  %v2952_v49 = vld [vmem:[#allocation11 + $0x80] ss:$16 sps:$4 sm:$0xff]   ;;  %v2954_v50 = vld [vmem:[#allocation11 + $0x64] ss:$16 sps:$4 sm:$0xff]  }
  0x39   :  { %359 = vmatprep.subr.bf16.mxu0 %v2401_v17  ;;  %472 = vmatprep.subr.bf16.mxu1 %v2403_v18  ;;  %v2959_v51 = vld [vmem:[#allocation11 + $0x88] ss:$16 sps:$4 sm:$0xff]   ;;  %v2433_v52 = vld [vmem:[#allocation6 + $0x10] sm:$0xff]   ;;  %v2965_v54 = vld [vmem:[#allocation11 + $0x6c] ss:$16 sps:$4 sm:$0xff]   ;;  %v2863_v16 = vmov 0.0|0.0   ;;  %v123_v17 = vlaneseq }
  0x3a   :  { %v2962_v53 = vld [vmem:[#allocation11 + $0x60] ss:$16 sps:$4 sm:$0xff]   ;;  %v2968_v55 = vld [vmem:[#allocation11 + $0x44] ss:$16 sps:$4 sm:$0xff]   ;;  %v2971_v56 = vld [vmem:[#allocation11 + $0x68] ss:$16 sps:$4 sm:$0xff]  }
  0x3b   :  { %v641_v57 = vld [vmem:[%s3740_s4] sm:$0xff]  ;;  %v2976_v58 = vld [vmem:[#allocation11 + $0x4c] ss:$16 sps:$4 sm:$0xff]   ;;  %v2996_v1 = vld [vmem:[#allocation11 + $0x48] ss:$16 sps:$4 sm:$0xff]   ;;  %v124_v18 = vshrl.u32 %v123_v17, 7 }
  0x3c   :  { %360 = vmatpush1.bf16.msra.mxu0 %v2405_v19  ;;  %473 = vmatpush1.bf16.msra.mxu1 %v2406_v20  ;;  %v2978_v59 = vadd.s32 4294967295, %v641_v57  ;;  %v642_v60 = vld [vmem:[%s3740_s4 + $0x8] sm:$0xff]  ;;  %v2986_v61 = vld [vmem:[#allocation11 + $0x40] ss:$16 sps:$4 sm:$0xff]   ;;  %v2993_v63 = vld [vmem:[#allocation11 + $0x24] ss:$16 sps:$4 sm:$0xff]  }
  0x3d   :  { %361 = vmatprep.subr.bf16.mxu0 %v2407_v21  ;;  %474 = vmatprep.subr.bf16.mxu1 %v2409_v22  ;;  %v2990_v62 = vadd.s32 4294967295, %v642_v60  ;;  %v2440_v3 = vld [vmem:[#allocation6 + $0x18] sm:$0xff]   ;;  %v3001_v4 = vld [vmem:[#allocation11 + $0x20] ss:$16 sps:$4 sm:$0xff]   ;;  %v3008_v6 = vld [vmem:[#allocation11 + $0x4] ss:$16 sps:$4 sm:$0xff]  }
  0x3e   :  { %vm999_vm0 = vcmp.eq.s32.totalorder %v2978_v59, 0  ;;  %v3003_v5 = vld [vmem:[#allocation11 + $0x2c] ss:$16 sps:$4 sm:$0xff]   ;;  %v3010_v7 = vld [vmem:[#allocation11 + $0x28] ss:$16 sps:$4 sm:$0xff]   ;;  %v2447_v12 = vld [vmem:[#allocation6 + $0x20] sm:$0xff]  }
  0x3f   :  { %v1001_v2 = vsel %vm999_vm0, 1, %v3742_v0  ;;  %vm1000_vm1 = vcmp.eq.s32.totalorder %v2990_v62, 0  ;;  %v3012_v8 = vld [vmem:[#allocation11 + $0xc] ss:$16 sps:$4 sm:$0xff]   ;;  %v3019_v10 = vld [vmem:[#allocation11] ss:$16 sps:$4 sm:$0xff]  }
  0x40   :  { %362 = vmatpush1.bf16.msra.mxu0 %v2411_v23  ;;  %475 = vmatpush1.bf16.msra.mxu1 %v2412_v24  ;;  %v1002_v9 = vsel %vm1000_vm1, 1, %v3742_v0  ;;  %v3023_v11 = vld [vmem:[#allocation11 + $0x8] ss:$16 sps:$4 sm:$0xff]   ;;  %v2461_v14 = vld [vmem:[#allocation6 + $0x30] sm:$0xff]   ;;  %vm1169_vm2 = vcmp.eq.s32.totalorder %v2978_v59, 1  ;;  %vm1170_vm3 = vcmp.eq.s32.totalorder %v2990_v62, 1 }
  0x41   :  { %363 = vmatprep.subr.bf16.mxu0 %v2413_v25  ;;  %476 = vmatprep.subr.bf16.mxu1 %v2415_v26  ;;  %v2454_v13 = vld [vmem:[#allocation6 + $0x28] sm:$0xff]   ;;  %v2471_v15 = vld [vmem:[#allocation6 + $0x38] sm:$0xff]   ;;  %v1171_v21 = vsel %vm1169_vm2, 1, %v3742_v0  ;;  %v1172_v24 = vsel %vm1170_vm3, 1, %v3742_v0  ;;  %v125_v25 = vsub.s32 0, %v124_v18  ;;  %v133_v26 = vsub.s32 2, %v124_v18 }
  0x42   :  { %1004 = vperm.xlu0 %2375, %v1001_v2   ;;  %1174 = vperm.xlu1 %2376, %v1171_v21   ;;  %vm1339_vm4 = vcmp.eq.s32.totalorder %v2978_v59, 2  ;;  %vm1340_vm5 = vcmp.eq.s32.totalorder %v2990_v62, 2  ;;  %vm1509_vm10 = vcmp.eq.s32.totalorder %v2978_v59, 3  ;;  %vm1510_vm11 = vcmp.eq.s32.totalorder %v2990_v62, 3 }
  0x43   :  { %vm1679_vm14 = vcmp.eq.s32.totalorder %v2978_v59, 4  ;;  %vm1680_vm15 = vcmp.eq.s32.totalorder %v2990_v62, 4  ;;  %vm1849_vm2 = vcmp.eq.s32.totalorder %v2978_v59, 5  ;;  %vm1850_vm3 = vcmp.eq.s32.totalorder %v2990_v62, 5 }
  0x44   :  { %364 = vmatpush1.bf16.msra.mxu0 %v2417_v27  ;;  %477 = vmatpush1.bf16.msra.mxu1 %v2418_v28  ;;  %v121_v27 = vld [vmem:[%s3739_s3] sm:$0xf]  ;;  %s2864_s3 = smov [#allocation12]  }
  0x45   :  { %365 = vmatprep.subr.bf16.mxu0 %v2419_v29  ;;  %478 = vmatprep.subr.bf16.mxu1 %v2421_v30  ;;  %v129_v30 = vsub.s32 1, %v124_v18  ;;  %s2221_s14 = sshll.u32 %s2864_s3, 4  ;;  %s2222_s14 = int_to_ptr.vmem [resolvable:$true] %s2221_s14 }
  0x46   :  { %1007 = vperm.xlu0 %2375, %v1002_v9   ;;  %1177 = vperm.xlu1 %2376, %v1172_v24   ;;  %s2829_s15 = scalar_lea.vmem %s2222_s14, 256  ;;  %p2834_p2 = scmp.lt.s32.totalorder %s2222_s14, %s2222_s14 }
  0x47   :  { %v3099_v2 = vrot.slane %v121_v27, %v129_v30  ;;  %p2830_p1 = scmp.ne.s32.totalorder %s2222_s14, %s2829_s15  ;;  %p2835_p3 = scmp.lt.s32.totalorder %s2829_s15, %s2829_s15 }
  0x48   :  { %366 = vmatpush1.bf16.msra.mxu0 %v2423_v31  ;;  %479 = vmatpush1.bf16.msra.mxu1 %v2424_v32  ;;  %v137_v31 = vsub.s32 3, %v124_v18 }
  0x49   :  { %856 = vmatprep.subr.bf16.mxu0 %v2910_v33  ;;  %899 = vmatprep.subr.bf16.mxu1 %v2912_v34  ;;  %p2836_p4 = por %p2835_p3, %p2834_p2 }
  0x4b   :  { %384 = vmatmul.mubr.bf16.vlgmr.msra.gmra.mxu0 %v2425_v35  ;;  %497 = vmatmul.mubr.bf16.vlgmr.msra.gmra.mxu1 %v2425_v35  ;;  %p2837_p5 = pnand %p2836_p4, %p2830_p1 }
  0x4c   :  { %857 = vmatpush1.bf16.msra.mxu0 %v2914_v36  ;;  %393 = vmatprep.mubr.bf16.mxu0 %v3742_v0 }
  0x4d   :  { %506 = vmatprep.mubr.bf16.mxu1 %v3742_v0  ;;  %858 = vmatprep.subr.bf16.mxu0 %v2917_v37 }
  0x4e   :  { %900 = vmatpush1.bf16.msra.mxu1 %v2920_v38 }
  0x4f   :  { %901 = vmatprep.subr.bf16.mxu1 %v2922_v39 }
  0x50   :  { %859 = vmatpush1.bf16.msra.mxu0 %v2926_v40 }
  0x51   :  { %860 = vmatprep.subr.bf16.mxu0 %v2930_v41 }
  0x52   :  { %902 = vmatpush1.bf16.msra.mxu1 %v2933_v42 }
  0x53   :  { %394 = vmatmul.mubr.bf16.gmra.mxu0 %v2429_v43  ;;  %507 = vmatmul.mubr.bf16.gmra.mxu1 %v2429_v43  ;;  %v3095_v43 = vrot.slane %v121_v27, %v125_v25 }
  0x54   :  { %403 = vmatprep.mubr.bf16.mxu0 %v3742_v0  ;;  %516 = vmatprep.mubr.bf16.mxu1 %v3742_v0 }
  0x55   :  { %861 = vmatpush1.bf16.msra.mxu0 %v2937_v44  ;;  %903 = vmatprep.subr.bf16.mxu1 %v2942_v46 }
  0x56   :  { %862 = vmatprep.subr.bf16.mxu0 %v2939_v45  ;;  %904 = vmatpush1.bf16.msra.mxu1 %v2945_v47 }
  0x57   :  { %905 = vmatprep.subr.bf16.mxu1 %v2947_v48 }
  0x59   :  { %863 = vmatpush1.bf16.msra.mxu0 %v2952_v49 }
  0x5a   :  { %864 = vmatprep.subr.bf16.mxu0 %v2954_v50  ;;  %906 = vmatpush1.bf16.msra.mxu1 %v2959_v51 }
  0x5b   :  { %404 = vmatmul.mubr.bf16.gmra.mxu0 %v2433_v52  ;;  %517 = vmatmul.mubr.bf16.gmra.mxu1 %v2433_v52  ;;  %v3097_v52 = vrot.slane %v121_v27, %v133_v26 }
  0x5c   :  { %413 = vmatprep.mubr.bf16.mxu0 %v3742_v0  ;;  %526 = vmatprep.mubr.bf16.mxu1 %v3742_v0 }
  0x5d   :  { %865 = vmatpush1.bf16.msra.mxu0 %v2962_v53  ;;  %907 = vmatprep.subr.bf16.mxu1 %v2965_v54 }
  0x5e   :  { %866 = vmatprep.subr.bf16.mxu0 %v2968_v55  ;;  %908 = vmatpush1.bf16.msra.mxu1 %v2971_v56 }
  0x5f   :  { %909 = vmatprep.subr.bf16.mxu1 %v2976_v58 }
  0x61   :  { %867 = vmatpush1.bf16.msra.mxu0 %v2986_v61 }
  0x62   :  { %868 = vmatprep.subr.bf16.mxu0 %v2993_v63  ;;  %910 = vmatpush1.bf16.msra.mxu1 %v2996_v1 }
  0x63   :  { %414 = vmatmul.mubr.bf16.gmra.mxu0 %v2440_v3  ;;  %527 = vmatmul.mubr.bf16.gmra.mxu1 %v2440_v3  ;;  %v3101_v3 = vrot.slane %v121_v27, %v137_v31 }
  0x64   :  { %423 = vmatprep.mubr.bf16.mxu0 %v3742_v0  ;;  %536 = vmatprep.mubr.bf16.mxu1 %v3742_v0 }
  0x65   :  { %869 = vmatpush1.bf16.msra.mxu0 %v3001_v4  ;;  %911 = vmatprep.subr.bf16.mxu1 %v3003_v5 }
  0x66   :  { %870 = vmatprep.subr.bf16.mxu0 %v3008_v6  ;;  %912 = vmatpush1.bf16.msra.mxu1 %v3010_v7 }
  0x67   :  { %913 = vmatprep.subr.bf16.mxu1 %v3012_v8 }
  0x69   :  { %871 = vmatpush1.bf16.msra.mxu0 %v3019_v10 }
  0x6a   :  { %914 = vmatpush1.bf16.msra.mxu1 %v3023_v11  ;;  %1025 = vmatprep.subr.bf16.mxu0 %v2910_v33 }
  0x6b   :  { %424 = vmatmul.mubr.bf16.gmra.mxu0 %v2447_v12  ;;  %537 = vmatmul.mubr.bf16.gmra.mxu1 %v2447_v12 }
  0x6c   :  { %433 = vmatprep.mubr.bf16.mxu0 %v3742_v0  ;;  %546 = vmatprep.mubr.bf16.mxu1 %v3742_v0 }
  0x6d   :  { %1068 = vmatprep.subr.bf16.mxu1 %v2912_v34 }
  0x73   :  { %434 = vmatmul.mubr.bf16.gmra.mxu0 %v2454_v13  ;;  %547 = vmatmul.mubr.bf16.gmra.mxu1 %v2454_v13 }
  0x74   :  { %443 = vmatprep.mubr.bf16.mxu0 %v3742_v0  ;;  %556 = vmatprep.mubr.bf16.mxu1 %v3742_v0 }
  0x7b   :  { %444 = vmatmul.mubr.bf16.gmra.mxu0 %v2461_v14  ;;  %557 = vmatmul.mubr.bf16.gmra.mxu1 %v2461_v14 }
  0x7c   :  { %453 = vmatprep.mubr.bf16.mxu0 %v3742_v0  ;;  %566 = vmatprep.mubr.bf16.mxu1 %v3742_v0 }
  0x83   :  { %454 = vmatmul.mubr.bf16.gmra.mxu0 %v2471_v15  ;;  %567 = vmatmul.mubr.bf16.gmra.mxu1 %v2471_v15 }
  0x84   :  { %888 = vmatprep.mubr.bf16.mxu0 %v3742_v0  ;;  %931 = vmatprep.mubr.bf16.mxu1 %v3742_v0 }
  0x8b   :  { %889 = vmatmul.mubr.bf16.vlgmr.msra.gmra.mxu0 %v2863_v16  ;;  %932 = vmatmul.mubr.bf16.vlgmr.msra.gmra.mxu1 %v2863_v16 }
  0x8c   :  { %1026 = vmatpush1.bf16.msra.mxu0 %v2914_v36  ;;  %1069 = vmatpush1.bf16.msra.mxu1 %v2920_v38 }
  0x8d   :  { %1027 = vmatprep.subr.bf16.mxu0 %v2917_v37  ;;  %1070 = vmatprep.subr.bf16.mxu1 %v2922_v39 }
  0x8e   :  { %1057 = vmatprep.mubr.bf16.mxu0 %v3742_v0  ;;  %1100 = vmatprep.mubr.bf16.mxu1 %v3742_v0 }
  0x90   :  { %1028 = vmatpush1.bf16.msra.mxu0 %v2926_v40  ;;  %1071 = vmatpush1.bf16.msra.mxu1 %v2933_v42 }
  0x91   :  { %1029 = vmatprep.subr.bf16.mxu0 %v2930_v41  ;;  %1072 = vmatprep.subr.bf16.mxu1 %v2942_v46 }
  0x94   :  { %1030 = vmatpush1.bf16.msra.mxu0 %v2937_v44  ;;  %1073 = vmatpush1.bf16.msra.mxu1 %v2945_v47 }
  0x95   :  { %1031 = vmatprep.subr.bf16.mxu0 %v2939_v45  ;;  %1074 = vmatprep.subr.bf16.mxu1 %v2947_v48 }
  0x98   :  { %1032 = vmatpush1.bf16.msra.mxu0 %v2952_v49  ;;  %1075 = vmatpush1.bf16.msra.mxu1 %v2959_v51 }
  0x99   :  { %1033 = vmatprep.subr.bf16.mxu0 %v2954_v50  ;;  %1076 = vmatprep.subr.bf16.mxu1 %v2965_v54 }
  0x9c   :  { %1034 = vmatpush1.bf16.msra.mxu0 %v2962_v53  ;;  %1077 = vmatpush1.bf16.msra.mxu1 %v2971_v56 }
  0x9d   :  { %1035 = vmatprep.subr.bf16.mxu0 %v2968_v55  ;;  %1078 = vmatprep.subr.bf16.mxu1 %v2976_v58 }
  0xa0   :  { %1036 = vmatpush1.bf16.msra.mxu0 %v2986_v61  ;;  %1079 = vmatpush1.bf16.msra.mxu1 %v2996_v1 }
  0xa1   :  { %1037 = vmatprep.subr.bf16.mxu0 %v2993_v63  ;;  %1080 = vmatprep.subr.bf16.mxu1 %v3003_v5 }
  0xa4   :  { %1038 = vmatpush1.bf16.msra.mxu0 %v3001_v4  ;;  %1081 = vmatpush1.bf16.msra.mxu1 %v3010_v7 }
  0xa5   :  { %1039 = vmatprep.subr.bf16.mxu0 %v3008_v6  ;;  %1082 = vmatprep.subr.bf16.mxu1 %v3012_v8 }
  0xa8   :  { %1040 = vmatpush1.bf16.msra.mxu0 %v3019_v10  ;;  %1083 = vmatpush1.bf16.msra.mxu1 %v3023_v11 }
  0xa9   :  { %1195 = vmatprep.subr.bf16.mxu0 %v2910_v33  ;;  %1238 = vmatprep.subr.bf16.mxu1 %v2912_v34 }
 0x10b   :  { %v3074_v19 = vpop.f32.mrf.mxu0  ;;  %v3076_v20 = vpop.f32.mrf.mxu1 }
 0x10d   :  { %v3079_v22 = vpop.f32.mrf.mxu0  ;;  %v3081_v23 = vpop.f32.mrf.mxu1 }
 0x10f   :  { %v3087_v28 = vpop.f32.mrf.mxu0  ;;  %v3089_v29 = vpop.f32.mrf.mxu1 }
 0x111   :  { %v3091_v32 = vpop.f32.mrf.mxu0  ;;  %v3093_v35 = vpop.f32.mrf.mxu1 }
 0x113   :  { %v395_v57 = vpop.f32.mrf.mxu0  ;;  %v508_v60 = vpop.f32.mrf.mxu1 }
 0x114   :  { %v3104_v9 = vadd.f32 %v395_v57, %v3095_v43  ;;  %v3107_v12 = vadd.f32 %v508_v60, %v3097_v52 }
 0x115   :  { %v397_v13 = vpop.f32.mrf.mxu0  ;;  %v510_v14 = vpop.f32.mrf.mxu1 }
 0x116   :  { %3744 = vst [vmem:[#allocation16_spill] sm:$0xff] %v3107_v12  ;;  %v3110_v15 = vadd.f32 %v397_v13, %v3099_v2  ;;  %v3113_v16 = vadd.f32 %v510_v14, %v3101_v3 }
 0x117   :  { %v399_v17 = vpop.f32.mrf.mxu0  ;;  %v512_v18 = vpop.f32.mrf.mxu1 }
 0x118   :  { %3745 = vst [vmem:[#allocation17_spill] sm:$0xff] %v3113_v16  ;;  %v3116_v21 = vadd.f32 %v399_v17, %v3095_v43  ;;  %v3119_v24 = vadd.f32 %v512_v18, %v3097_v52 }
 0x119   :  { %v401_v25 = vpop.f32.mrf.mxu0  ;;  %v514_v26 = vpop.f32.mrf.mxu1 }
 0x11a   :  { %3746 = vst [vmem:[#allocation18_spill] sm:$0xff] %v3119_v24  ;;  %v3122_v27 = vadd.f32 %v401_v25, %v3099_v2  ;;  %v3125_v30 = vadd.f32 %v514_v26, %v3101_v3 }
 0x11b   :  { %v405_v31 = vpop.f32.mrf.mxu0  ;;  %v518_v57 = vpop.f32.mrf.mxu1 }
 0x11c   :  { %3747 = vst [vmem:[#allocation19_spill] sm:$0xff] %v3122_v27  ;;  %3748 = vst [vmem:[#allocation20_spill] sm:$0xff] %v3125_v30  ;;  %v3128_v60 = vadd.f32 %v405_v31, %v3095_v43  ;;  %v3131_v13 = vadd.f32 %v518_v57, %v3097_v52 }
 0x11d   :  { %v407_v14 = vpop.f32.mrf.mxu0  ;;  %v520_v17 = vpop.f32.mrf.mxu1 }
 0x11e   :  { %3749 = vst [vmem:[#allocation21_spill] sm:$0xff] %v3128_v60  ;;  %3750 = vst [vmem:[#allocation22_spill] sm:$0xff] %v3131_v13  ;;  %v3134_v18 = vadd.f32 %v407_v14, %v3099_v2  ;;  %v3137_v0 = vadd.f32 %v520_v17, %v3101_v3 }
 0x11f   :  { %v409_v25 = vpop.f32.mrf.mxu0  ;;  %v522_v24 = vpop.f32.mrf.mxu1 }
 0x120   :  { %3751 = vst [vmem:[#allocation23_spill] sm:$0xff] %v3134_v18  ;;  %3752 = vst [vmem:[#allocation24_spill] sm:$0xff] %v3137_v0  ;;  %v3140_v26 = vadd.f32 %v409_v25, %v3095_v43  ;;  %v3143_v30 = vadd.f32 %v522_v24, %v3097_v52 }
 0x121   :  { %v411_v31 = vpop.f32.mrf.mxu0  ;;  %v524_v60 = vpop.f32.mrf.mxu1 }
 0x122   :  { %3753 = vst [vmem:[#allocation25_spill] sm:$0xff] %v3140_v26  ;;  %3754 = vst [vmem:[#allocation26_spill] sm:$0xff] %v3143_v30  ;;  %v3146_v57 = vadd.f32 %v411_v31, %v3099_v2  ;;  %v3149_v13 = vadd.f32 %v524_v60, %v3101_v3 }
 0x123   :  { %v415_v14 = vpop.f32.mrf.mxu0  ;;  %v528_v18 = vpop.f32.mrf.mxu1 }
 0x124   :  { %3755 = vst [vmem:[#allocation27_spill] sm:$0xff] %v3146_v57  ;;  %3756 = vst [vmem:[#allocation28_spill] sm:$0xff] %v3149_v13  ;;  %v3152_v17 = vadd.f32 %v415_v14, %v3095_v43  ;;  %v3155_v0 = vadd.f32 %v528_v18, %v3097_v52 }
 0x125   :  { %v417_v25 = vpop.f32.mrf.mxu0  ;;  %v530_v26 = vpop.f32.mrf.mxu1 }
 0x126   :  { %3757 = vst [vmem:[#allocation29_spill] sm:$0xff] %v3152_v17  ;;  %3758 = vst [vmem:[#allocation30_spill] sm:$0xff] %v3155_v0  ;;  %v3158_v24 = vadd.f32 %v417_v25, %v3099_v2  ;;  %v3161_v30 = vadd.f32 %v530_v26, %v3101_v3 }
 0x127   :  { %v419_v31 = vpop.f32.mrf.mxu0  ;;  %v532_v57 = vpop.f32.mrf.mxu1 }
 0x128   :  { %3759 = vst [vmem:[#allocation31_spill] sm:$0xff] %v3158_v24  ;;  %3760 = vst [vmem:[#allocation32_spill] sm:$0xff] %v3161_v30  ;;  %v3164_v60 = vadd.f32 %v419_v31, %v3095_v43  ;;  %v3167_v13 = vadd.f32 %v532_v57, %v3097_v52 }
 0x129   :  { %v421_v14 = vpop.f32.mrf.mxu0  ;;  %v534_v17 = vpop.f32.mrf.mxu1 }
 0x12a   :  { %3761 = vst [vmem:[#allocation33_spill] sm:$0xff] %v3164_v60  ;;  %3762 = vst [vmem:[#allocation34_spill] sm:$0xff] %v3167_v13  ;;  %v3170_v18 = vadd.f32 %v421_v14, %v3099_v2  ;;  %v3173_v0 = vadd.f32 %v534_v17, %v3101_v3 }
 0x12b   :  { %v425_v25 = vpop.f32.mrf.mxu0  ;;  %v538_v24 = vpop.f32.mrf.mxu1 }
 0x12c   :  { %3763 = vst [vmem:[#allocation35_spill] sm:$0xff] %v3170_v18  ;;  %3764 = vst [vmem:[#allocation36_spill] sm:$0xff] %v3173_v0  ;;  %v3176_v26 = vadd.f32 %v425_v25, %v3095_v43  ;;  %v3179_v30 = vadd.f32 %v538_v24, %v3097_v52 }
 0x12d   :  { %v427_v31 = vpop.f32.mrf.mxu0  ;;  %v540_v60 = vpop.f32.mrf.mxu1 }
 0x12e   :  { %3765 = vst [vmem:[#allocation37_spill] sm:$0xff] %v3176_v26  ;;  %3766 = vst [vmem:[#allocation38_spill] sm:$0xff] %v3179_v30  ;;  %v3182_v57 = vadd.f32 %v427_v31, %v3099_v2  ;;  %v3185_v13 = vadd.f32 %v540_v60, %v3101_v3 }
 0x12f   :  { %v429_v14 = vpop.f32.mrf.mxu0  ;;  %v542_v18 = vpop.f32.mrf.mxu1 }
 0x130   :  { %3767 = vst [vmem:[#allocation39_spill] sm:$0xff] %v3182_v57  ;;  %3768 = vst [vmem:[#allocation40_spill] sm:$0xff] %v3185_v13  ;;  %v3188_v17 = vadd.f32 %v429_v14, %v3095_v43  ;;  %v3191_v0 = vadd.f32 %v542_v18, %v3097_v52 }
 0x131   :  { %v431_v25 = vpop.f32.mrf.mxu0  ;;  %v544_v26 = vpop.f32.mrf.mxu1 }
 0x132   :  { %3769 = vst [vmem:[#allocation41_spill] sm:$0xff] %v3188_v17  ;;  %3770 = vst [vmem:[#allocation42_spill] sm:$0xff] %v3191_v0  ;;  %v3194_v24 = vadd.f32 %v431_v25, %v3099_v2  ;;  %v3197_v30 = vadd.f32 %v544_v26, %v3101_v3 }
 0x133   :  { %v435_v31 = vpop.f32.mrf.mxu0  ;;  %v548_v57 = vpop.f32.mrf.mxu1 }
 0x134   :  { %3771 = vst [vmem:[#allocation43_spill] sm:$0xff] %v3194_v24  ;;  %3772 = vst [vmem:[#allocation44_spill] sm:$0xff] %v3197_v30  ;;  %v3200_v60 = vadd.f32 %v435_v31, %v3095_v43  ;;  %v3203_v13 = vadd.f32 %v548_v57, %v3097_v52 }
 0x135   :  { %v437_v14 = vpop.f32.mrf.mxu0  ;;  %v550_v17 = vpop.f32.mrf.mxu1 }
 0x136   :  { %3773 = vst [vmem:[#allocation45_spill] sm:$0xff] %v3200_v60  ;;  %3774 = vst [vmem:[#allocation46_spill] sm:$0xff] %v3203_v13  ;;  %v3206_v18 = vadd.f32 %v437_v14, %v3099_v2  ;;  %v3209_v0 = vadd.f32 %v550_v17, %v3101_v3 }
 0x137   :  { %v439_v25 = vpop.f32.mrf.mxu0  ;;  %v552_v24 = vpop.f32.mrf.mxu1 }
 0x138   :  { %3775 = vst [vmem:[#allocation47_spill] sm:$0xff] %v3206_v18  ;;  %3776 = vst [vmem:[#allocation48_spill] sm:$0xff] %v3209_v0  ;;  %v3212_v26 = vadd.f32 %v439_v25, %v3095_v43  ;;  %v3215_v30 = vadd.f32 %v552_v24, %v3097_v52 }
 0x139   :  { %v441_v31 = vpop.f32.mrf.mxu0  ;;  %v554_v60 = vpop.f32.mrf.mxu1 }
 0x13a   :  { %3777 = vst [vmem:[#allocation49_spill] sm:$0xff] %v3212_v26  ;;  %3778 = vst [vmem:[#allocation50_spill] sm:$0xff] %v3215_v30  ;;  %v3218_v57 = vadd.f32 %v441_v31, %v3099_v2  ;;  %v3221_v13 = vadd.f32 %v554_v60, %v3101_v3 }
 0x13b   :  { %v445_v14 = vpop.f32.mrf.mxu0  ;;  %v558_v18 = vpop.f32.mrf.mxu1 }
 0x13c   :  { %3779 = vst [vmem:[#allocation51_spill] sm:$0xff] %v3218_v57  ;;  %3780 = vst [vmem:[#allocation52_spill] sm:$0xff] %v3221_v13  ;;  %v3224_v17 = vadd.f32 %v445_v14, %v3095_v43  ;;  %v3227_v0 = vadd.f32 %v558_v18, %v3097_v52 }
 0x13d   :  { %v447_v25 = vpop.f32.mrf.mxu0  ;;  %v560_v26 = vpop.f32.mrf.mxu1 }
 0x13e   :  { %3781 = vst [vmem:[#allocation53_spill] sm:$0xff] %v3224_v17  ;;  %3782 = vst [vmem:[#allocation54_spill] sm:$0xff] %v3227_v0  ;;  %v3230_v24 = vadd.f32 %v447_v25, %v3099_v2  ;;  %v3233_v30 = vadd.f32 %v560_v26, %v3101_v3 }
 0x13f   :  { %v449_v31 = vpop.f32.mrf.mxu0  ;;  %v562_v57 = vpop.f32.mrf.mxu1 }
 0x140   :  { %3783 = vst [vmem:[#allocation55_spill] sm:$0xff] %v3230_v24  ;;  %3784 = vst [vmem:[#allocation56_spill] sm:$0xff] %v3233_v30  ;;  %v3236_v60 = vadd.f32 %v449_v31, %v3095_v43  ;;  %v3239_v13 = vadd.f32 %v562_v57, %v3097_v52 }
 0x141   :  { %v451_v14 = vpop.f32.mrf.mxu0  ;;  %v564_v17 = vpop.f32.mrf.mxu1 }
 0x142   :  { %3785 = vst [vmem:[#allocation57_spill] sm:$0xff] %v3236_v60  ;;  %3786 = vst [vmem:[#allocation58_spill] sm:$0xff] %v3239_v13  ;;  %v3242_v18 = vadd.f32 %v451_v14, %v3099_v2  ;;  %v3245_v0 = vadd.f32 %v564_v17, %v3101_v3 }
 0x143   :  { %v455_v25 = vpop.f32.mrf.mxu0  ;;  %v568_v24 = vpop.f32.mrf.mxu1 }
 0x144   :  { %3787 = vst [vmem:[#allocation59_spill] sm:$0xff] %v3242_v18  ;;  %3788 = vst [vmem:[#allocation60_spill] sm:$0xff] %v3245_v0  ;;  %v3248_v26 = vadd.f32 %v455_v25, %v3095_v43  ;;  %v3251_v30 = vadd.f32 %v568_v24, %v3097_v52  ;;  %v386_v24 = vadd.f32 %v3074_v19, %v3095_v43 }
 0x145   :  { %v457_v31 = vpop.f32.mrf.mxu0  ;;  %v570_v60 = vpop.f32.mrf.mxu1  ;;  %v392_v19 = vadd.f32 %v3091_v32, %v3099_v2 }
 0x146   :  { %3789 = vst [vmem:[#allocation61_spill] sm:$0xff] %v3248_v26  ;;  %3790 = vst [vmem:[#allocation62_spill] sm:$0xff] %v3251_v30  ;;  %v3254_v57 = vadd.f32 %v457_v31, %v3099_v2  ;;  %v3257_v13 = vadd.f32 %v570_v60, %v3101_v3 }
 0x147   :  { %v459_v14 = vpop.f32.mrf.mxu0  ;;  %v572_v18 = vpop.f32.mrf.mxu1 }
 0x148   :  { %3791 = vst [vmem:[#allocation63_spill] sm:$0xff] %v3254_v57  ;;  %3792 = vst [vmem:[#allocation64_spill] sm:$0xff] %v3257_v13  ;;  %v3260_v17 = vadd.f32 %v459_v14, %v3095_v43  ;;  %v3263_v0 = vadd.f32 %v572_v18, %v3097_v52  ;;  %v388_v13 = vadd.f32 %v3079_v22, %v3099_v2 }
 0x149   :  { %v461_v25 = vpop.f32.mrf.mxu0  ;;  %v574_v26 = vpop.f32.mrf.mxu1  ;;  %v390_v18 = vadd.f32 %v3087_v28, %v3095_v43  ;;  %v501_v28 = vadd.f32 %v3081_v23, %v3101_v3 }
 0x14a   :  { %3793 = vst [vmem:[#allocation65_spill] sm:$0xff] %v3260_v17  ;;  %3794 = vst [vmem:[#allocation66_spill] sm:$0xff] %v3263_v0  ;;  %v3268_v30 = vadd.f32 %v461_v25, %v3099_v2  ;;  %v3271_v31 = vadd.f32 %v574_v26, %v3101_v3 }
 0x14b   :  { %v890_v60 = vpop.f32.mrf.mxu0  ;;  %v933_v17 = vpop.f32.mrf.mxu1 }
 0x14c   :  { %3795 = vst [vmem:[#allocation67_spill] sm:$0xff] %v3268_v30  ;;  %3796 = vst [vmem:[#allocation68_spill] sm:$0xff] %v3271_v31  ;;  %v942_v14 = vadd.f32 %v890_v60, %v386_v24 }
 0x14d   :  { %v892_v57 = vpop.f32.mrf.mxu0  ;;  %v935_v26 = vpop.f32.mrf.mxu1 }
 0x14e   :  { %v2315_v0 = vmul.f32 -1.442695, %v942_v14  ;;  %v943_v12 = vadd.f32 %v892_v57, %v388_v13  ;;  %v945_v43 = vadd.f32 %v935_v26, %v501_v28  ;;  %v499_v13 = vadd.f32 %v3076_v20, %v3097_v52 }
 0x14f   :  { %v894_v16 = vpop.f32.mrf.mxu0  ;;  %v937_v24 = vpop.f32.mrf.mxu1 }
 0x150   :  { %2481 = vpow2.f32 %v2315_v0  ;;  %v2317_v25 = vmul.f32 -1.442695, %v943_v12  ;;  %v946_v31 = vadd.f32 %v894_v16, %v390_v18  ;;  %v505_v0 = vadd.f32 %v3093_v35, %v3101_v3 }
 0x151   :  { %v896_v30 = vpop.f32.mrf.mxu0  ;;  %v939_v32 = vpop.f32.mrf.mxu1  ;;  %v944_v2 = vadd.f32 %v933_v17, %v499_v13  ;;  %v503_v12 = vadd.f32 %v3089_v29, %v3097_v52  ;;  %v2319_v16 = vmul.f32 -1.442695, %v945_v43 }
 0x152   :  { %2483 = vpow2.f32 %v2317_v25  ;;  %v2316_v27 = vmul.f32 -1.442695, %v946_v31  ;;  %v947_v22 = vadd.f32 %v896_v30, %v392_v19 }
 0x153   :  { %v948_v57 = vadd.f32 %v937_v24, %v503_v12 }
 0x154   :  { %2485 = vpow2.f32 %v2316_v27  ;;  %v2318_v60 = vmul.f32 -1.442695, %v947_v22  ;;  %v949_v27 = vadd.f32 %v939_v32, %v505_v0 }
 0x156   :  { %2487 = vpow2.f32 %v2318_v60  ;;  %v2320_v14 = vmul.f32 -1.442695, %v949_v27 }
 0x157   :  { %2489 = vtanh.f32 %v944_v2 }
 0x158   :  { %2491 = vpow2.f32 %v2319_v16 }
 0x15d   :  { %v2482_v30 = vpop.eup %2481 }
 0x15e   :  { %v956_v31 = vadd.f32 1.0, %v2482_v30 }
 0x15f   :  { %v2484_v23 = vpop.eup %2483 }
 0x160   :  { %2493 = vrcp.f32 %v956_v31  ;;  %v968_v18 = vadd.f32 1.0, %v2484_v23 }
 0x161   :  { %v2486_v20 = vpop.eup %2485  ;;  %2495 = vtanh.f32 %v948_v57 }
 0x162   :  { %2497 = vrcp.f32 %v968_v18  ;;  %v957_v19 = vadd.f32 1.0, %v2486_v20  ;;  %v3797_v20 = vmov 0  }
 0x163   :  { %v2488_v35 = vpop.eup %2487  ;;  %2499 = vpow2.f32 %v2320_v14 }
 0x164   :  { %2501 = vrcp.f32 %v957_v19  ;;  %v969_v3 = vadd.f32 1.0, %v2488_v35  ;;  %v2490_v29 = vpop.eup %2489 }
 0x165   :  { %v2492_v52 = vpop.eup %2491 }
 0x166   :  { %2503 = vrcp.f32 %v969_v3  ;;  %v982_v43 = vadd.f32 1.0, %v2492_v52 }
 0x168   :  { %2505 = vrcp.f32 %v982_v43 }
 0x16d   :  { %v2494_v17 = vpop.eup %2493 }
 0x16e   :  { %v2496_v25 = vpop.eup %2495  ;;  %v990_v26 = vmul.f32 %v2494_v17, %v2490_v29 }
 0x16f   :  { %v2498_v22 = vpop.eup %2497 }
 0x170   :  { %v2500_v24 = vpop.eup %2499  ;;  %v988_v60 = vmul.f32 0.0, %v2498_v22 }
 0x171   :  { %v2502_v28 = vpop.eup %2501  ;;  %v983_v2 = vadd.f32 1.0, %v2500_v24  ;;  %v3798_v24 = vld [vmem:[#allocation19_spill] sm:$0xff] }
 0x172   :  { %v3287_v13 = vadd.f32 %v990_v26, %v988_v60  ;;  %v991_v32 = vmul.f32 %v2502_v28, %v2496_v25 }
 0x173   :  { %v2504_v0 = vpop.eup %2503 }
 0x174   :  { %v989_v12 = vmul.f32 0.0, %v2504_v0  ;;  %2507 = vtanh.f32 %v3287_v13 }
 0x175   :  { %2509 = vrcp.f32 %v983_v2  ;;  %v2506_v27 = vpop.eup %2505  ;;  %v3800_v2 = vld [vmem:[#allocation16_spill] sm:$0xff] }
 0x176   :  { %v3290_v16 = vadd.f32 %v991_v32, %v989_v12 }
 0x178   :  { %2511 = vtanh.f32 %v3290_v16 }
 0x181   :  { %v2508_v30 = vpop.eup %2507 }
 0x182   :  { %v2510_v57 = vpop.eup %2509  ;;  %v3293_v23 = vmul.f32 %v2508_v30, %v2506_v27  ;;  %v3801_v27 = vld [vmem:[#allocation20_spill] sm:$0xff] }
 0x185   :  { %v2512_v31 = vpop.eup %2511 }
 0x186   :  { %v3295_v14 = vmul.f32 %v2512_v31, %v2510_v57  ;;  %v3802_v31 = vld [vmem:[#allocation18_spill] sm:$0xff] }
 0x188   :  { %v1024_v18 = vpack.c.bf16 %v3295_v14, %v3293_v23 }
 0x18a   :  { %1058 = vmatmul.mubr.bf16.vlgmr.msra.gmra.mxu0 %v1024_v18  ;;  %1101 = vmatmul.mubr.bf16.vlgmr.msra.gmra.mxu1 %v1024_v18 }
 0x18b   :  { %1196 = vmatpush1.bf16.msra.mxu0 %v2914_v36  ;;  %1239 = vmatpush1.bf16.msra.mxu1 %v2920_v38  ;;  %v1341_v36 = vsel %vm1339_vm4, 1, %v3797_v20 }
 0x18c   :  { %1197 = vmatprep.subr.bf16.mxu0 %v2917_v37  ;;  %1240 = vmatprep.subr.bf16.mxu1 %v2922_v39  ;;  %v1342_v37 = vsel %vm1340_vm5, 1, %v3797_v20 }
 0x18d   :  { %1227 = vmatprep.mubr.bf16.mxu0 %v3797_v20  ;;  %1270 = vmatprep.mubr.bf16.mxu1 %v3797_v20 }
 0x18e   :  { %1344 = vperm.xlu0 %2375, %v1341_v36   ;;  %1347 = vperm.xlu1 %2376, %v1342_v37  }
 0x18f   :  { %1198 = vmatpush1.bf16.msra.mxu0 %v2926_v40  ;;  %1241 = vmatpush1.bf16.msra.mxu1 %v2933_v42 }
 0x190   :  { %1199 = vmatprep.subr.bf16.mxu0 %v2930_v41  ;;  %1242 = vmatprep.subr.bf16.mxu1 %v2942_v46 }
 0x193   :  { %1200 = vmatpush1.bf16.msra.mxu0 %v2937_v44  ;;  %1243 = vmatpush1.bf16.msra.mxu1 %v2945_v47 }
 0x194   :  { %1201 = vmatprep.subr.bf16.mxu0 %v2939_v45  ;;  %1244 = vmatprep.subr.bf16.mxu1 %v2947_v48 }
 0x197   :  { %1202 = vmatpush1.bf16.msra.mxu0 %v2952_v49  ;;  %1245 = vmatpush1.bf16.msra.mxu1 %v2959_v51 }
 0x198   :  { %1203 = vmatprep.subr.bf16.mxu0 %v2954_v50  ;;  %1246 = vmatprep.subr.bf16.mxu1 %v2965_v54 }
 0x19b   :  { %1204 = vmatpush1.bf16.msra.mxu0 %v2962_v53  ;;  %1247 = vmatpush1.bf16.msra.mxu1 %v2971_v56 }
 0x19c   :  { %1205 = vmatprep.subr.bf16.mxu0 %v2968_v55  ;;  %1248 = vmatprep.subr.bf16.mxu1 %v2976_v58 }
 0x19f   :  { %1206 = vmatpush1.bf16.msra.mxu0 %v2986_v61  ;;  %1249 = vmatpush1.bf16.msra.mxu1 %v2996_v1 }
 0x1a0   :  { %1207 = vmatprep.subr.bf16.mxu0 %v2993_v63  ;;  %1250 = vmatprep.subr.bf16.mxu1 %v3003_v5 }
 0x1a3   :  { %1208 = vmatpush1.bf16.msra.mxu0 %v3001_v4  ;;  %1251 = vmatpush1.bf16.msra.mxu1 %v3010_v7 }
 0x1a4   :  { %1209 = vmatprep.subr.bf16.mxu0 %v3008_v6  ;;  %1252 = vmatprep.subr.bf16.mxu1 %v3012_v8 }
 0x1a7   :  { %1210 = vmatpush1.bf16.msra.mxu0 %v3019_v10  ;;  %1253 = vmatpush1.bf16.msra.mxu1 %v3023_v11 }
 0x1a8   :  { %1365 = vmatprep.subr.bf16.mxu0 %v2910_v33  ;;  %1408 = vmatprep.subr.bf16.mxu1 %v2912_v34 }
 0x24a   :  { %v1059_v38 = vpop.f32.mrf.mxu0  ;;  %v1102_v35 = vpop.f32.mrf.mxu1 }
 0x24b   :  { %v1111_v19 = vadd.f32 %v1059_v38, %v3104_v9  ;;  %v3799_v9 = vld [vmem:[#allocation17_spill] sm:$0xff] }
 0x24c   :  { %v1061_v3 = vpop.f32.mrf.mxu0  ;;  %v1104_v17 = vpop.f32.mrf.mxu1 }
 0x24d   :  { %v2321_v29 = vmul.f32 -1.442695, %v1111_v19  ;;  %v1112_v33 = vadd.f32 %v1061_v3, %v3110_v15  ;;  %v1114_v32 = vadd.f32 %v1104_v17, %v3799_v9  ;;  %v1113_v15 = vadd.f32 %v1102_v35, %v3800_v2 }
 0x24e   :  { %v1063_v52 = vpop.f32.mrf.mxu0  ;;  %v1106_v28 = vpop.f32.mrf.mxu1 }
 0x24f   :  { %2513 = vpow2.f32 %v2321_v29  ;;  %v2323_v34 = vmul.f32 -1.442695, %v1112_v33  ;;  %v1115_v25 = vadd.f32 %v1063_v52, %v3116_v21  ;;  %v2325_v12 = vmul.f32 -1.442695, %v1114_v32 }
 0x250   :  { %v1065_v26 = vpop.f32.mrf.mxu0  ;;  %v1108_v0 = vpop.f32.mrf.mxu1  ;;  %v1117_v21 = vadd.f32 %v1106_v28, %v3802_v31 }
 0x251   :  { %2515 = vpow2.f32 %v2323_v34  ;;  %v2322_v22 = vmul.f32 -1.442695, %v1115_v25  ;;  %v1116_v60 = vadd.f32 %v1065_v26, %v3798_v24  ;;  %v1118_v30 = vadd.f32 %v1108_v0, %v3801_v27  ;;  %v1175_v27 = vpop.permute.xlu1 %1174 }
 0x252   :  { %vm1179_vm7 = vcmp.eq.s32.totalorder %v1175_v27, 1 }
 0x253   :  { %2517 = vpow2.f32 %v2322_v22  ;;  %v2324_v43 = vmul.f32 -1.442695, %v1116_v60  ;;  %v2326_v37 = vmul.f32 -1.442695, %v1118_v30 }
 0x255   :  { %2519 = vpow2.f32 %v2324_v43 }
 0x256   :  { %2521 = vtanh.f32 %v1113_v15 }
 0x257   :  { %2523 = vpow2.f32 %v2325_v12  ;;  %v1005_v12 = vpop.permute.xlu0 %1004 }
 0x258   :  { %vm1009_vm6 = vcmp.eq.s32.totalorder %v1005_v12, 1 }
 0x25c   :  { %v2514_v57 = vpop.eup %2513 }
 0x25d   :  { %v1125_v18 = vadd.f32 1.0, %v2514_v57  ;;  %v1008_v57 = vpop.permute.xlu0 %1007 }
 0x25e   :  { %v2516_v36 = vpop.eup %2515  ;;  %vm1010_vm8 = vcmp.eq.s32.totalorder %v1008_v57, 1 }
 0x25f   :  { %2525 = vrcp.f32 %v1125_v18  ;;  %v1137_v38 = vadd.f32 1.0, %v2516_v36  ;;  %v1011_v18 = vsel %vm1009_vm6, %v3293_v23, 0.0  ;;  %v3365_v23 = vld [vmem:[#allocation11 + $0xc4] ss:$16 sps:$4 sm:$0xff]   ;;  %vm2019_vm6 = vcmp.eq.s32.totalorder %v2978_v59, 6 }
 0x260   :  { %v2518_v19 = vpop.eup %2517  ;;  %2527 = vtanh.f32 %v1117_v21  ;;  %v1178_v21 = vpop.permute.xlu1 %1177 }
 0x261   :  { %2529 = vrcp.f32 %v1137_v38  ;;  %v1126_v3 = vadd.f32 1.0, %v2518_v19  ;;  %vm1180_vm9 = vcmp.eq.s32.totalorder %v1178_v21, 1  ;;  %v1012_v19 = vsel %vm1010_vm8, %v3295_v14, 0.0 }
 0x262   :  { %v2520_v29 = vpop.eup %2519  ;;  %2531 = vpow2.f32 %v2326_v37 }
 0x263   :  { %2533 = vrcp.f32 %v1126_v3  ;;  %v1138_v35 = vadd.f32 1.0, %v2520_v29  ;;  %v2522_v33 = vpop.eup %2521 }
 0x264   :  { %v2524_v52 = vpop.eup %2523 }
 0x265   :  { %2535 = vrcp.f32 %v1138_v35  ;;  %v1151_v22 = vadd.f32 1.0, %v2524_v52  ;;  %v3359_v35 = vld [vmem:[#allocation11 + $0xe0] ss:$16 sps:$4 sm:$0xff]  }
 0x267   :  { %2537 = vrcp.f32 %v1151_v22 }
 0x26c   :  { %v2526_v34 = vpop.eup %2525 }
 0x26d   :  { %v2528_v17 = vpop.eup %2527  ;;  %v1159_v25 = vmul.f32 %v2526_v34, %v2522_v33  ;;  %v3362_v33 = vld [vmem:[#allocation11 + $0xe8] ss:$16 sps:$4 sm:$0xff]   ;;  %v3809_v34 = vld [vmem:[#allocation28_spill] sm:$0xff] }
 0x26e   :  { %v2530_v26 = vpop.eup %2529 }
 0x26f   :  { %v2532_v24 = vpop.eup %2531  ;;  %v1157_v60 = vmul.f32 %v2530_v26, %v3287_v13  ;;  %v3810_v26 = vld [vmem:[#allocation26_spill] sm:$0xff] }
 0x270   :  { %v2534_v28 = vpop.eup %2533  ;;  %v1152_v0 = vadd.f32 1.0, %v2532_v24 }
 0x271   :  { %v3346_v43 = vadd.f32 %v1159_v25, %v1157_v60  ;;  %v1160_v9 = vmul.f32 %v2534_v28, %v2528_v17 }
 0x272   :  { %v2536_v32 = vpop.eup %2535 }
 0x273   :  { %v1158_v2 = vmul.f32 %v2536_v32, %v3290_v16  ;;  %2539 = vtanh.f32 %v3346_v43 }
 0x274   :  { %2541 = vrcp.f32 %v1152_v0  ;;  %v2538_v30 = vpop.eup %2537 }
 0x275   :  { %v3350_v15 = vadd.f32 %v1160_v9, %v1158_v2 }
 0x277   :  { %2543 = vtanh.f32 %v3350_v15 }
 0x280   :  { %v2540_v13 = vpop.eup %2539 }
 0x281   :  { %v1165_v31 = vmul.f32 %v2540_v13, %v2538_v30  ;;  %v2542_v36 = vpop.eup %2541 }
 0x283   :  { %v3354_v16 = vsel %vm1179_vm7, %v1165_v31, %v1011_v18  ;;  %vm2020_vm7 = vcmp.eq.s32.totalorder %v2990_v62, 6 }
 0x284   :  { %v2544_v37 = vpop.eup %2543 }
 0x285   :  { %v1166_v38 = vmul.f32 %v2544_v37, %v2542_v36 }
 0x287   :  { %v3357_v3 = vsel %vm1180_vm9, %v1166_v38, %v1012_v19  ;;  %v1194_v29 = vpack.c.bf16 %v1166_v38, %v1165_v31 }
 0x289   :  { %1228 = vmatmul.mubr.bf16.vlgmr.msra.gmra.mxu0 %v1194_v29  ;;  %1271 = vmatmul.mubr.bf16.vlgmr.msra.gmra.mxu1 %v1194_v29 }
 0x28a   :  { %1366 = vmatpush1.bf16.msra.mxu0 %v3359_v35  ;;  %1409 = vmatpush1.bf16.msra.mxu1 %v3362_v33 }
 0x28b   :  { %1367 = vmatprep.subr.bf16.mxu0 %v3365_v23  ;;  %1410 = vmatprep.subr.bf16.mxu1 %v2922_v39  ;;  %v3397_v39 = vld [vmem:[#allocation11 + $0xe4] ss:$16 sps:$4 sm:$0xff]  }
 0x28c   :  { %1397 = vmatprep.mubr.bf16.mxu0 %v3797_v20  ;;  %1440 = vmatprep.mubr.bf16.mxu1 %v3797_v20 }
 0x28e   :  { %1368 = vmatpush1.bf16.msra.mxu0 %v2926_v40  ;;  %1411 = vmatpush1.bf16.msra.mxu1 %v2933_v42  ;;  %v3400_v40 = vld [vmem:[#allocation11 + $0xec] ss:$16 sps:$4 sm:$0xff]   ;;  %v1512_v42 = vsel %vm1510_vm11, 1, %v3797_v20  ;;  %vm2189_vm11 = vcmp.eq.s32.totalorder %v2978_v59, 7 }
 0x28f   :  { %1369 = vmatprep.subr.bf16.mxu0 %v2930_v41  ;;  %1412 = vmatprep.subr.bf16.mxu1 %v2942_v46  ;;  %v1511_v41 = vsel %vm1509_vm10, 1, %v3797_v20  ;;  %vm2190_vm10 = vcmp.eq.s32.totalorder %v2990_v62, 7 }
 0x290   :  { %1514 = vperm.xlu0 %2375, %v1511_v41   ;;  %1517 = vperm.xlu1 %2376, %v1512_v42  }
 0x292   :  { %1370 = vmatpush1.bf16.msra.mxu0 %v2937_v44  ;;  %1413 = vmatpush1.bf16.msra.mxu1 %v2945_v47 }
 0x293   :  { %1371 = vmatprep.subr.bf16.mxu0 %v2939_v45  ;;  %1414 = vmatprep.subr.bf16.mxu1 %v2947_v48  ;;  %v3803_v45 = vld [vmem:[#allocation21_spill] sm:$0xff] }
 0x296   :  { %1372 = vmatpush1.bf16.msra.mxu0 %v2952_v49  ;;  %1415 = vmatpush1.bf16.msra.mxu1 %v2959_v51 }
 0x297   :  { %1373 = vmatprep.subr.bf16.mxu0 %v2954_v50  ;;  %1416 = vmatprep.subr.bf16.mxu1 %v2965_v54  ;;  %v3804_v50 = vld [vmem:[#allocation23_spill] sm:$0xff] }
 0x29a   :  { %1374 = vmatpush1.bf16.msra.mxu0 %v2962_v53  ;;  %1417 = vmatpush1.bf16.msra.mxu1 %v2971_v56  ;;  %v3805_v56 = vld [vmem:[#allocation25_spill] sm:$0xff] }
 0x29b   :  { %1375 = vmatprep.subr.bf16.mxu0 %v2968_v55  ;;  %1418 = vmatprep.subr.bf16.mxu1 %v2976_v58 }
 0x29e   :  { %1376 = vmatpush1.bf16.msra.mxu0 %v2986_v61  ;;  %1419 = vmatpush1.bf16.msra.mxu1 %v2996_v1  ;;  %v3806_v1 = vld [vmem:[#allocation27_spill] sm:$0xff] }
 0x29f   :  { %1377 = vmatprep.subr.bf16.mxu0 %v2993_v63  ;;  %1420 = vmatprep.subr.bf16.mxu1 %v3003_v5 }
 0x2a2   :  { %1378 = vmatpush1.bf16.msra.mxu0 %v3001_v4  ;;  %1421 = vmatpush1.bf16.msra.mxu1 %v3010_v7  ;;  %v3807_v7 = vld [vmem:[#allocation24_spill] sm:$0xff] }
 0x2a3   :  { %1379 = vmatprep.subr.bf16.mxu0 %v3008_v6  ;;  %1422 = vmatprep.subr.bf16.mxu1 %v3012_v8 }
 0x2a6   :  { %1380 = vmatpush1.bf16.msra.mxu0 %v3019_v10  ;;  %1423 = vmatpush1.bf16.msra.mxu1 %v3023_v11  ;;  %v3808_v11 = vld [vmem:[#allocation22_spill] sm:$0xff] }
 0x2a7   :  { %1535 = vmatprep.subr.bf16.mxu0 %v3397_v39  ;;  %1578 = vmatprep.subr.bf16.mxu1 %v3400_v40 }
 0x349   :  { %v1229_v44 = vpop.f32.mrf.mxu0  ;;  %v1272_v47 = vpop.f32.mrf.mxu1 }
 0x34a   :  { %v1281_v46 = vadd.f32 %v1229_v44, %v3803_v45  ;;  %v1283_v14 = vadd.f32 %v1272_v47, %v3808_v11  ;;  %v3473_v11 = vld [vmem:[#allocation11 + $0x60] ss:$16 sps:$4 sm:$0xff]  }
 0x34b   :  { %v1231_v48 = vpop.f32.mrf.mxu0  ;;  %v1274_v55 = vpop.f32.mrf.mxu1 }
 0x34c   :  { %v2327_v49 = vmul.f32 -1.442695, %v1281_v46  ;;  %v1282_v51 = vadd.f32 %v1231_v48, %v3804_v50  ;;  %v1284_v8 = vadd.f32 %v1274_v55, %v3807_v7  ;;  %v1345_v46 = vpop.permute.xlu0 %1344  ;;  %v3464_v7 = vld [vmem:[#allocation11 + $0x88] ss:$16 sps:$4 sm:$0xff]  }
 0x34d   :  { %v1233_v53 = vpop.f32.mrf.mxu0  ;;  %v1276_v5 = vpop.f32.mrf.mxu1  ;;  %vm1349_vm12 = vcmp.eq.s32.totalorder %v1345_v46, 1 }
 0x34e   :  { %2545 = vpow2.f32 %v2327_v49  ;;  %v2329_v54 = vmul.f32 -1.442695, %v1282_v51  ;;  %v1285_v58 = vadd.f32 %v1233_v53, %v3805_v56  ;;  %v2331_v52 = vmul.f32 -1.442695, %v1284_v8  ;;  %v1348_v49 = vpop.permute.xlu1 %1347  ;;  %v3432_v56 = vld [vmem:[#allocation11 + $0xcc] ss:$16 sps:$4 sm:$0xff]  }
 0x34f   :  { %v1235_v61 = vpop.f32.mrf.mxu0  ;;  %v1278_v10 = vpop.f32.mrf.mxu1  ;;  %v1287_v22 = vadd.f32 %v1276_v5, %v3810_v26  ;;  %vm1350_vm13 = vcmp.eq.s32.totalorder %v1348_v49, 1  ;;  %v3458_v5 = vld [vmem:[#allocation11 + $0x8c] ss:$16 sps:$4 sm:$0xff]   ;;  %v3467_v8 = vld [vmem:[#allocation11 + $0x64] ss:$16 sps:$4 sm:$0xff]  }
 0x350   :  { %2547 = vpow2.f32 %v2329_v54  ;;  %v2328_v63 = vmul.f32 -1.442695, %v1285_v58  ;;  %v1286_v4 = vadd.f32 %v1235_v61, %v3806_v1  ;;  %v1288_v17 = vadd.f32 %v1278_v10, %v3809_v34  ;;  %v3443_v58 = vld [vmem:[#allocation11 + $0xa4] ss:$16 sps:$4 sm:$0xff]   ;;  %v3446_v61 = vld [vmem:[#allocation11 + $0xac] ss:$16 sps:$4 sm:$0xff]  }
 0x351   :  { %v3452_v1 = vld [vmem:[#allocation11 + $0xa8] ss:$16 sps:$4 sm:$0xff]   ;;  %v3470_v10 = vld [vmem:[#allocation11 + $0x6c] ss:$16 sps:$4 sm:$0xff]   ;;  %v3491_v26 = vld [vmem:[#allocation11 + $0x24] ss:$16 sps:$4 sm:$0xff]  }
 0x352   :  { %2549 = vpow2.f32 %v2328_v63  ;;  %v2330_v6 = vmul.f32 -1.442695, %v1286_v4  ;;  %v2332_v28 = vmul.f32 -1.442695, %v1288_v17  ;;  %v3449_v63 = vld [vmem:[#allocation11 + $0xa0] ss:$16 sps:$4 sm:$0xff]  }
 0x353   :  { %v3455_v4 = vld [vmem:[#allocation11 + $0x84] ss:$16 sps:$4 sm:$0xff]   ;;  %v3482_v34 = vld [vmem:[#allocation11 + $0x4c] ss:$16 sps:$4 sm:$0xff]   ;;  %v3485_v17 = vld [vmem:[#allocation11 + $0x40] ss:$16 sps:$4 sm:$0xff]  }
 0x354   :  { %2551 = vpow2.f32 %v2330_v6  ;;  %v3461_v6 = vld [vmem:[#allocation11 + $0x80] ss:$16 sps:$4 sm:$0xff]  }
 0x355   :  { %2553 = vtanh.f32 %v1283_v14  ;;  %v3476_v14 = vld [vmem:[#allocation11 + $0x68] ss:$16 sps:$4 sm:$0xff]  }
 0x356   :  { %2555 = vpow2.f32 %v2331_v52  ;;  %v3479_v52 = vld [vmem:[#allocation11 + $0x44] ss:$16 sps:$4 sm:$0xff]  }
 0x35b   :  { %v2546_v25 = vpop.eup %2545 }
 0x35c   :  { %v1295_v24 = vadd.f32 1.0, %v2546_v25  ;;  %v3488_v25 = vld [vmem:[#allocation11 + $0x48] ss:$16 sps:$4 sm:$0xff]  }
 0x35d   :  { %v2548_v60 = vpop.eup %2547 }
 0x35e   :  { %2557 = vrcp.f32 %v1295_v24  ;;  %v1307_v9 = vadd.f32 1.0, %v2548_v60  ;;  %v3497_v24 = vld [vmem:[#allocation11 + $0x20] ss:$16 sps:$4 sm:$0xff]   ;;  %v3500_v60 = vld [vmem:[#allocation11 + $0x28] ss:$16 sps:$4 sm:$0xff]  }
 0x35f   :  { %v2550_v32 = vpop.eup %2549  ;;  %2559 = vtanh.f32 %v1287_v22  ;;  %v3494_v22 = vld [vmem:[#allocation11 + $0x2c] ss:$16 sps:$4 sm:$0xff]  }
 0x360   :  { %2561 = vrcp.f32 %v1307_v9  ;;  %v1296_v0 = vadd.f32 1.0, %v2550_v32  ;;  %v3506_v9 = vld [vmem:[#allocation11 + $0xc] ss:$16 sps:$4 sm:$0xff]   ;;  %v3509_v32 = vld [vmem:[#allocation11] ss:$16 sps:$4 sm:$0xff]  }
 0x361   :  { %v2552_v2 = vpop.eup %2551  ;;  %2563 = vpow2.f32 %v2332_v28  ;;  %v3503_v28 = vld [vmem:[#allocation11 + $0x4] ss:$16 sps:$4 sm:$0xff]  }
 0x362   :  { %2565 = vrcp.f32 %v1296_v0  ;;  %v1308_v12 = vadd.f32 1.0, %v2552_v2  ;;  %v2554_v27 = vpop.eup %2553  ;;  %v3512_v0 = vld [vmem:[#allocation11 + $0x8] ss:$16 sps:$4 sm:$0xff]   ;;  %v1681_v2 = vsel %vm1679_vm14, 1, %v3797_v20 }
 0x363   :  { %v2556_v30 = vpop.eup %2555  ;;  %1684 = vperm.xlu0 %2375, %v1681_v2  }
 0x364   :  { %2567 = vrcp.f32 %v1308_v12  ;;  %v1321_v18 = vadd.f32 1.0, %v2556_v30  ;;  %v1682_v12 = vsel %vm1680_vm15, 1, %v3797_v20  ;;  %v3811_v30 = vld [vmem:[#allocation29_spill] sm:$0xff] }
 0x365   :  { %1687 = vperm.xlu1 %2376, %v1682_v12  }
 0x366   :  { %2569 = vrcp.f32 %v1321_v18  ;;  %v3812_v18 = vld [vmem:[#allocation31_spill] sm:$0xff] }
 0x36b   :  { %v2558_v13 = vpop.eup %2557 }
 0x36c   :  { %v2560_v57 = vpop.eup %2559  ;;  %v1329_v31 = vmul.f32 %v2558_v13, %v2554_v27 }
 0x36d   :  { %v2562_v21 = vpop.eup %2561 }
 0x36e   :  { %v2564_v36 = vpop.eup %2563  ;;  %v1327_v37 = vmul.f32 %v2562_v21, %v3346_v43 }
 0x36f   :  { %v2566_v38 = vpop.eup %2565  ;;  %v1322_v42 = vadd.f32 1.0, %v2564_v36 }
 0x370   :  { %v3416_v19 = vadd.f32 %v1329_v31, %v1327_v37  ;;  %v1330_v29 = vmul.f32 %v2566_v38, %v2560_v57 }
 0x371   :  { %v2568_v41 = vpop.eup %2567 }
 0x372   :  { %v1328_v44 = vmul.f32 %v2568_v41, %v3350_v15  ;;  %2571 = vtanh.f32 %v3416_v19  ;;  %v3813_v41 = vld [vmem:[#allocation33_spill] sm:$0xff] }
 0x373   :  { %2573 = vrcp.f32 %v1322_v42  ;;  %v2570_v47 = vpop.eup %2569 }
 0x374   :  { %v3420_v45 = vadd.f32 %v1330_v29, %v1328_v44 }
 0x376   :  { %2575 = vtanh.f32 %v3420_v45 }
 0x37f   :  { %v2572_v48 = vpop.eup %2571 }
 0x380   :  { %v1335_v43 = vmul.f32 %v2572_v48, %v2570_v47  ;;  %v2574_v50 = vpop.eup %2573  ;;  %v3814_v47 = vld [vmem:[#allocation35_spill] sm:$0xff] }
 0x382   :  { %v3424_v51 = vsel %vm1349_vm12, %v1335_v43, %v3354_v16  ;;  %v3437_v16 = vld [vmem:[#allocation11 + $0xc0] ss:$16 sps:$4 sm:$0xff]  }
 0x383   :  { %v2576_v53 = vpop.eup %2575 }
 0x384   :  { %v1336_v15 = vmul.f32 %v2576_v53, %v2574_v50  ;;  %v3815_v50 = vld [vmem:[#allocation32_spill] sm:$0xff] }
 0x386   :  { %v3427_v54 = vsel %vm1350_vm13, %v1336_v15, %v3357_v3  ;;  %v1364_v55 = vpack.c.bf16 %v1336_v15, %v1335_v43  ;;  %v3440_v3 = vld [vmem:[#allocation11 + $0xc8] ss:$16 sps:$4 sm:$0xff]  }
 0x388   :  { %1398 = vmatmul.mubr.bf16.vlgmr.msra.gmra.mxu0 %v1364_v55  ;;  %1441 = vmatmul.mubr.bf16.vlgmr.msra.gmra.mxu1 %v1364_v55  ;;  %v3816_v55 = vld [vmem:[#allocation30_spill] sm:$0xff] }
 0x389   :  { %1536 = vmatpush1.bf16.msra.mxu0 %v3359_v35  ;;  %1579 = vmatpush1.bf16.msra.mxu1 %v3362_v33 }
 0x38a   :  { %1537 = vmatprep.subr.bf16.mxu0 %v3365_v23  ;;  %1580 = vmatprep.subr.bf16.mxu1 %v3432_v56 }
 0x38b   :  { %1567 = vmatprep.mubr.bf16.mxu0 %v3797_v20  ;;  %1610 = vmatprep.mubr.bf16.mxu1 %v3797_v20 }
 0x38d   :  { %1538 = vmatpush1.bf16.msra.mxu0 %v3437_v16  ;;  %1581 = vmatpush1.bf16.msra.mxu1 %v3440_v3 }
 0x38e   :  { %1539 = vmatprep.subr.bf16.mxu0 %v3443_v58  ;;  %1582 = vmatprep.subr.bf16.mxu1 %v3446_v61 }
 0x391   :  { %1540 = vmatpush1.bf16.msra.mxu0 %v3449_v63  ;;  %1583 = vmatpush1.bf16.msra.mxu1 %v3452_v1 }
 0x392   :  { %1541 = vmatprep.subr.bf16.mxu0 %v3455_v4  ;;  %1584 = vmatprep.subr.bf16.mxu1 %v3458_v5 }
 0x395   :  { %1542 = vmatpush1.bf16.msra.mxu0 %v3461_v6  ;;  %1585 = vmatpush1.bf16.msra.mxu1 %v3464_v7 }
 0x396   :  { %1543 = vmatprep.subr.bf16.mxu0 %v3467_v8  ;;  %1586 = vmatprep.subr.bf16.mxu1 %v3470_v10 }
 0x399   :  { %1544 = vmatpush1.bf16.msra.mxu0 %v3473_v11  ;;  %1587 = vmatpush1.bf16.msra.mxu1 %v3476_v14 }
 0x39a   :  { %1545 = vmatprep.subr.bf16.mxu0 %v3479_v52  ;;  %1588 = vmatprep.subr.bf16.mxu1 %v3482_v34 }
 0x39d   :  { %1546 = vmatpush1.bf16.msra.mxu0 %v3485_v17  ;;  %1589 = vmatpush1.bf16.msra.mxu1 %v3488_v25 }
 0x39e   :  { %1547 = vmatprep.subr.bf16.mxu0 %v3491_v26  ;;  %1590 = vmatprep.subr.bf16.mxu1 %v3494_v22 }
 0x3a1   :  { %1548 = vmatpush1.bf16.msra.mxu0 %v3497_v24  ;;  %1591 = vmatpush1.bf16.msra.mxu1 %v3500_v60 }
 0x3a2   :  { %1549 = vmatprep.subr.bf16.mxu0 %v3503_v28  ;;  %1592 = vmatprep.subr.bf16.mxu1 %v3506_v9 }
 0x3a5   :  { %1550 = vmatpush1.bf16.msra.mxu0 %v3509_v32  ;;  %1593 = vmatpush1.bf16.msra.mxu1 %v3512_v0 }
 0x3a6   :  { %1705 = vmatprep.subr.bf16.mxu0 %v3397_v39  ;;  %1748 = vmatprep.subr.bf16.mxu1 %v3400_v40 }
 0x448   :  { %v1399_v27 = vpop.f32.mrf.mxu0  ;;  %v1442_v57 = vpop.f32.mrf.mxu1 }
 0x449   :  { %v1451_v13 = vadd.f32 %v1399_v27, %v3811_v30  ;;  %v1453_v2 = vadd.f32 %v1442_v57, %v3816_v55  ;;  %v3817_v27 = vld [vmem:[#allocation36_spill] sm:$0xff] }
 0x44a   :  { %v1401_v31 = vpop.f32.mrf.mxu0  ;;  %v1444_v29 = vpop.f32.mrf.mxu1 }
 0x44b   :  { %v2333_v21 = vmul.f32 -1.442695, %v1451_v13  ;;  %v1452_v36 = vadd.f32 %v1401_v31, %v3812_v18  ;;  %v1454_v53 = vadd.f32 %v1444_v29, %v3815_v50  ;;  %v3818_v31 = vld [vmem:[#allocation34_spill] sm:$0xff] }
 0x44c   :  { %v1403_v37 = vpop.f32.mrf.mxu0  ;;  %v1446_v43 = vpop.f32.mrf.mxu1 }
 0x44d   :  { %2577 = vpow2.f32 %v2333_v21  ;;  %v2335_v38 = vmul.f32 -1.442695, %v1452_v36  ;;  %v1455_v42 = vadd.f32 %v1403_v37, %v3813_v41  ;;  %v2337_v12 = vmul.f32 -1.442695, %v1454_v53 }
 0x44e   :  { %v1405_v44 = vpop.f32.mrf.mxu0  ;;  %v1448_v15 = vpop.f32.mrf.mxu1  ;;  %v1457_v21 = vadd.f32 %v1446_v43, %v3818_v31 }
 0x44f   :  { %2579 = vpow2.f32 %v2335_v38  ;;  %v2334_v46 = vmul.f32 -1.442695, %v1455_v42  ;;  %v1456_v48 = vadd.f32 %v1405_v44, %v3814_v47  ;;  %v1458_v30 = vadd.f32 %v1448_v15, %v3817_v27 }
 0x451   :  { %2581 = vpow2.f32 %v2334_v46  ;;  %v2336_v49 = vmul.f32 -1.442695, %v1456_v48  ;;  %v2338_v37 = vmul.f32 -1.442695, %v1458_v30 }
 0x453   :  { %2583 = vpow2.f32 %v2336_v49 }
 0x454   :  { %2585 = vtanh.f32 %v1453_v2 }
 0x455   :  { %2587 = vpow2.f32 %v2337_v12 }
 0x45a   :  { %v2578_v13 = vpop.eup %2577 }
 0x45b   :  { %v1465_v18 = vadd.f32 1.0, %v2578_v13 }
 0x45c   :  { %v2580_v36 = vpop.eup %2579 }
 0x45d   :  { %2589 = vrcp.f32 %v1465_v18  ;;  %v1477_v38 = vadd.f32 1.0, %v2580_v36 }
 0x45e   :  { %v2582_v41 = vpop.eup %2581  ;;  %2591 = vtanh.f32 %v1457_v21  ;;  %v1515_v21 = vpop.permute.xlu0 %1514 }
 0x45f   :  { %2593 = vrcp.f32 %v1477_v38  ;;  %v1466_v29 = vadd.f32 1.0, %v2582_v41  ;;  %vm1519_vm0 = vcmp.eq.s32.totalorder %v1515_v21, 1 }
 0x460   :  { %v2584_v42 = vpop.eup %2583  ;;  %2595 = vpow2.f32 %v2338_v37  ;;  %v1518_v37 = vpop.permute.xlu1 %1517 }
 0x461   :  { %2597 = vrcp.f32 %v1466_v29  ;;  %v1478_v57 = vadd.f32 1.0, %v2584_v42  ;;  %v2586_v44 = vpop.eup %2585  ;;  %vm1520_vm1 = vcmp.eq.s32.totalorder %v1518_v37, 1 }
 0x462   :  { %v2588_v46 = vpop.eup %2587 }
 0x463   :  { %2599 = vrcp.f32 %v1478_v57  ;;  %v1491_v50 = vadd.f32 1.0, %v2588_v46  ;;  %v3819_v46 = vld [vmem:[#allocation37_spill] sm:$0xff] }
 0x465   :  { %2601 = vrcp.f32 %v1491_v50  ;;  %v3820_v50 = vld [vmem:[#allocation39_spill] sm:$0xff] }
 0x46a   :  { %v2590_v47 = vpop.eup %2589 }
 0x46b   :  { %v2592_v48 = vpop.eup %2591  ;;  %v1499_v43 = vmul.f32 %v2590_v47, %v2586_v44 }
 0x46c   :  { %v2594_v49 = vpop.eup %2593 }
 0x46d   :  { %v2596_v53 = vpop.eup %2595  ;;  %v1497_v15 = vmul.f32 %v2594_v49, %v3416_v19 }
 0x46e   :  { %v2598_v55 = vpop.eup %2597  ;;  %v1492_v30 = vadd.f32 1.0, %v2596_v53 }
 0x46f   :  { %v3530_v2 = vadd.f32 %v1499_v43, %v1497_v15  ;;  %v1500_v12 = vmul.f32 %v2598_v55, %v2592_v48 }
 0x470   :  { %v2600_v27 = vpop.eup %2599 }
 0x471   :  { %v1498_v13 = vmul.f32 %v2600_v27, %v3420_v45  ;;  %2603 = vtanh.f32 %v3530_v2  ;;  %v3821_v27 = vld [vmem:[#allocation41_spill] sm:$0xff] }
 0x472   :  { %2605 = vrcp.f32 %v1492_v30  ;;  %v2602_v18 = vpop.eup %2601 }
 0x473   :  { %v3534_v31 = vadd.f32 %v1500_v12, %v1498_v13 }
 0x475   :  { %2607 = vtanh.f32 %v3534_v31 }
 0x47e   :  { %v2604_v36 = vpop.eup %2603 }
 0x47f   :  { %v1505_v19 = vmul.f32 %v2604_v36, %v2602_v18  ;;  %v2606_v38 = vpop.eup %2605  ;;  %v3822_v18 = vld [vmem:[#allocation43_spill] sm:$0xff] }
 0x481   :  { %v3538_v41 = vsel %vm1519_vm0, %v1505_v19, %v3424_v51  ;;  %v1851_v51 = vsel %vm1849_vm2, 1, %v3797_v20 }
 0x482   :  { %v2608_v29 = vpop.eup %2607  ;;  %1854 = vperm.xlu0 %2375, %v1851_v51  }
 0x483   :  { %v1506_v45 = vmul.f32 %v2608_v29, %v2606_v38  ;;  %v3823_v38 = vld [vmem:[#allocation40_spill] sm:$0xff] }
 0x485   :  { %v3541_v42 = vsel %vm1520_vm1, %v1506_v45, %v3427_v54  ;;  %v1534_v57 = vpack.c.bf16 %v1506_v45, %v1505_v19  ;;  %v1852_v54 = vsel %vm1850_vm3, 1, %v3797_v20 }
 0x486   :  { %1857 = vperm.xlu1 %2376, %v1852_v54  }
 0x487   :  { %1568 = vmatmul.mubr.bf16.vlgmr.msra.gmra.mxu0 %v1534_v57  ;;  %1611 = vmatmul.mubr.bf16.vlgmr.msra.gmra.mxu1 %v1534_v57  ;;  %v3824_v57 = vld [vmem:[#allocation38_spill] sm:$0xff] }
 0x488   :  { %1706 = vmatpush1.bf16.msra.mxu0 %v3359_v35  ;;  %1749 = vmatpush1.bf16.msra.mxu1 %v3362_v33 }
 0x489   :  { %1707 = vmatprep.subr.bf16.mxu0 %v3365_v23  ;;  %1750 = vmatprep.subr.bf16.mxu1 %v3432_v56 }
 0x48a   :  { %1737 = vmatprep.mubr.bf16.mxu0 %v3797_v20  ;;  %1780 = vmatprep.mubr.bf16.mxu1 %v3797_v20 }
 0x48c   :  { %1708 = vmatpush1.bf16.msra.mxu0 %v3437_v16  ;;  %1751 = vmatpush1.bf16.msra.mxu1 %v3440_v3 }
 0x48d   :  { %1709 = vmatprep.subr.bf16.mxu0 %v3443_v58  ;;  %1752 = vmatprep.subr.bf16.mxu1 %v3446_v61 }
 0x490   :  { %1710 = vmatpush1.bf16.msra.mxu0 %v3449_v63  ;;  %1753 = vmatpush1.bf16.msra.mxu1 %v3452_v1 }
 0x491   :  { %1711 = vmatprep.subr.bf16.mxu0 %v3455_v4  ;;  %1754 = vmatprep.subr.bf16.mxu1 %v3458_v5 }
 0x494   :  { %1712 = vmatpush1.bf16.msra.mxu0 %v3461_v6  ;;  %1755 = vmatpush1.bf16.msra.mxu1 %v3464_v7 }
 0x495   :  { %1713 = vmatprep.subr.bf16.mxu0 %v3467_v8  ;;  %1756 = vmatprep.subr.bf16.mxu1 %v3470_v10 }
 0x498   :  { %1714 = vmatpush1.bf16.msra.mxu0 %v3473_v11  ;;  %1757 = vmatpush1.bf16.msra.mxu1 %v3476_v14 }
 0x499   :  { %1715 = vmatprep.subr.bf16.mxu0 %v3479_v52  ;;  %1758 = vmatprep.subr.bf16.mxu1 %v3482_v34 }
 0x49c   :  { %1716 = vmatpush1.bf16.msra.mxu0 %v3485_v17  ;;  %1759 = vmatpush1.bf16.msra.mxu1 %v3488_v25 }
 0x49d   :  { %1717 = vmatprep.subr.bf16.mxu0 %v3491_v26  ;;  %1760 = vmatprep.subr.bf16.mxu1 %v3494_v22 }
 0x4a0   :  { %1718 = vmatpush1.bf16.msra.mxu0 %v3497_v24  ;;  %1761 = vmatpush1.bf16.msra.mxu1 %v3500_v60 }
 0x4a1   :  { %1719 = vmatprep.subr.bf16.mxu0 %v3503_v28  ;;  %1762 = vmatprep.subr.bf16.mxu1 %v3506_v9 }
 0x4a4   :  { %1720 = vmatpush1.bf16.msra.mxu0 %v3509_v32  ;;  %1763 = vmatpush1.bf16.msra.mxu1 %v3512_v0 }
 0x4a5   :  { %1875 = vmatprep.subr.bf16.mxu0 %v3397_v39  ;;  %1918 = vmatprep.subr.bf16.mxu1 %v3400_v40 }
 0x547   :  { %v1569_v44 = vpop.f32.mrf.mxu0  ;;  %v1612_v48 = vpop.f32.mrf.mxu1 }
 0x548   :  { %v1621_v47 = vadd.f32 %v1569_v44, %v3819_v46  ;;  %v1623_v51 = vadd.f32 %v1612_v48, %v3824_v57  ;;  %v3825_v44 = vld [vmem:[#allocation44_spill] sm:$0xff] }
 0x549   :  { %v1571_v43 = vpop.f32.mrf.mxu0  ;;  %v1614_v12 = vpop.f32.mrf.mxu1 }
 0x54a   :  { %v2339_v49 = vmul.f32 -1.442695, %v1621_v47  ;;  %v1622_v53 = vadd.f32 %v1571_v43, %v3820_v50  ;;  %v1624_v29 = vadd.f32 %v1614_v12, %v3823_v38  ;;  %v3826_v43 = vld [vmem:[#allocation42_spill] sm:$0xff] }
 0x54b   :  { %v1573_v15 = vpop.f32.mrf.mxu0  ;;  %v1616_v19 = vpop.f32.mrf.mxu1 }
 0x54c   :  { %2609 = vpow2.f32 %v2339_v49  ;;  %v2341_v55 = vmul.f32 -1.442695, %v1622_v53  ;;  %v1625_v30 = vadd.f32 %v1573_v15, %v3821_v27  ;;  %v2343_v54 = vmul.f32 -1.442695, %v1624_v29 }
 0x54d   :  { %v1575_v13 = vpop.f32.mrf.mxu0  ;;  %v1618_v45 = vpop.f32.mrf.mxu1  ;;  %v1627_v49 = vadd.f32 %v1616_v19, %v3826_v43 }
 0x54e   :  { %2611 = vpow2.f32 %v2341_v55  ;;  %v2340_v21 = vmul.f32 -1.442695, %v1625_v30  ;;  %v1626_v36 = vadd.f32 %v1575_v13, %v3822_v18  ;;  %v1628_v46 = vadd.f32 %v1618_v45, %v3825_v44 }
 0x550   :  { %2613 = vpow2.f32 %v2340_v21  ;;  %v2342_v37 = vmul.f32 -1.442695, %v1626_v36  ;;  %v2344_v15 = vmul.f32 -1.442695, %v1628_v46 }
 0x552   :  { %2615 = vpow2.f32 %v2342_v37 }
 0x553   :  { %2617 = vtanh.f32 %v1623_v51 }
 0x554   :  { %2619 = vpow2.f32 %v2343_v54 }
 0x559   :  { %v2610_v47 = vpop.eup %2609 }
 0x55a   :  { %v1635_v50 = vadd.f32 1.0, %v2610_v47 }
 0x55b   :  { %v2612_v53 = vpop.eup %2611 }
 0x55c   :  { %2621 = vrcp.f32 %v1635_v50  ;;  %v1647_v55 = vadd.f32 1.0, %v2612_v53 }
 0x55d   :  { %v2614_v27 = vpop.eup %2613  ;;  %2623 = vtanh.f32 %v1627_v49  ;;  %v1685_v49 = vpop.permute.xlu0 %1684 }
 0x55e   :  { %2625 = vrcp.f32 %v1647_v55  ;;  %v1636_v12 = vadd.f32 1.0, %v2614_v27  ;;  %vm1689_vm4 = vcmp.eq.s32.totalorder %v1685_v49, 1 }
 0x55f   :  { %v2616_v30 = vpop.eup %2615  ;;  %2627 = vpow2.f32 %v2344_v15  ;;  %v1688_v15 = vpop.permute.xlu1 %1687 }
 0x560   :  { %2629 = vrcp.f32 %v1636_v12  ;;  %v1648_v48 = vadd.f32 1.0, %v2616_v30  ;;  %v2618_v13 = vpop.eup %2617  ;;  %vm1690_vm5 = vcmp.eq.s32.totalorder %v1688_v15, 1 }
 0x561   :  { %v2620_v21 = vpop.eup %2619 }
 0x562   :  { %2631 = vrcp.f32 %v1648_v48  ;;  %v1661_v38 = vadd.f32 1.0, %v2620_v21  ;;  %v3827_v21 = vld [vmem:[#allocation45_spill] sm:$0xff] }
 0x564   :  { %2633 = vrcp.f32 %v1661_v38  ;;  %v3828_v38 = vld [vmem:[#allocation47_spill] sm:$0xff] }
 0x569   :  { %v2622_v18 = vpop.eup %2621 }
 0x56a   :  { %v2624_v36 = vpop.eup %2623  ;;  %v1669_v19 = vmul.f32 %v2622_v18, %v2618_v13 }
 0x56b   :  { %v2626_v37 = vpop.eup %2625 }
 0x56c   :  { %v2628_v29 = vpop.eup %2627  ;;  %v1667_v45 = vmul.f32 %v2626_v37, %v3530_v2 }
 0x56d   :  { %v2630_v57 = vpop.eup %2629  ;;  %v1662_v46 = vadd.f32 1.0, %v2628_v29 }
 0x56e   :  { %v3590_v51 = vadd.f32 %v1669_v19, %v1667_v45  ;;  %v1670_v54 = vmul.f32 %v2630_v57, %v2624_v36  ;;  %v3829_v57 = vld [vmem:[#allocation49_spill] sm:$0xff] }
 0x56f   :  { %v2632_v44 = vpop.eup %2631 }
 0x570   :  { %v1668_v47 = vmul.f32 %v2632_v44, %v3534_v31  ;;  %2635 = vtanh.f32 %v3590_v51 }
 0x571   :  { %2637 = vrcp.f32 %v1662_v46  ;;  %v2634_v50 = vpop.eup %2633 }
 0x572   :  { %v3594_v43 = vadd.f32 %v1670_v54, %v1668_v47  ;;  %v3830_v47 = vld [vmem:[#allocation51_spill] sm:$0xff] }
 0x574   :  { %2639 = vtanh.f32 %v3594_v43 }
 0x57d   :  { %v2636_v53 = vpop.eup %2635 }
 0x57e   :  { %v1675_v2 = vmul.f32 %v2636_v53, %v2634_v50  ;;  %v2638_v55 = vpop.eup %2637 }
 0x580   :  { %v3598_v27 = vsel %vm1689_vm4, %v1675_v2, %v3538_v41  ;;  %v2021_v41 = vsel %vm2019_vm6, 1, %v3797_v20 }
 0x581   :  { %v2640_v12 = vpop.eup %2639  ;;  %2024 = vperm.xlu0 %2375, %v2021_v41   ;;  %v3833_v41 = vld [vmem:[#allocation52_spill] sm:$0xff] }
 0x582   :  { %v1676_v31 = vmul.f32 %v2640_v12, %v2638_v55  ;;  %v3832_v12 = vld [vmem:[#allocation46_spill] sm:$0xff] }
 0x584   :  { %v3601_v30 = vsel %vm1690_vm5, %v1676_v31, %v3541_v42  ;;  %v1704_v48 = vpack.c.bf16 %v1676_v31, %v1675_v2  ;;  %v2022_v42 = vsel %vm2020_vm7, 1, %v3797_v20  ;;  %v3831_v2 = vld [vmem:[#allocation48_spill] sm:$0xff] }
 0x585   :  { %2027 = vperm.xlu1 %2376, %v2022_v42  }
 0x586   :  { %1738 = vmatmul.mubr.bf16.vlgmr.msra.gmra.mxu0 %v1704_v48  ;;  %1781 = vmatmul.mubr.bf16.vlgmr.msra.gmra.mxu1 %v1704_v48 }
 0x587   :  { %1876 = vmatpush1.bf16.msra.mxu0 %v3359_v35  ;;  %1919 = vmatpush1.bf16.msra.mxu1 %v3362_v33 }
 0x588   :  { %1877 = vmatprep.subr.bf16.mxu0 %v3365_v23  ;;  %1920 = vmatprep.subr.bf16.mxu1 %v3432_v56 }
 0x589   :  { %1907 = vmatprep.mubr.bf16.mxu0 %v3797_v20  ;;  %1950 = vmatprep.mubr.bf16.mxu1 %v3797_v20 }
 0x58b   :  { %1878 = vmatpush1.bf16.msra.mxu0 %v3437_v16  ;;  %1921 = vmatpush1.bf16.msra.mxu1 %v3440_v3 }
 0x58c   :  { %1879 = vmatprep.subr.bf16.mxu0 %v3443_v58  ;;  %1922 = vmatprep.subr.bf16.mxu1 %v3446_v61 }
 0x58f   :  { %1880 = vmatpush1.bf16.msra.mxu0 %v3449_v63  ;;  %1923 = vmatpush1.bf16.msra.mxu1 %v3452_v1 }
 0x590   :  { %1881 = vmatprep.subr.bf16.mxu0 %v3455_v4  ;;  %1924 = vmatprep.subr.bf16.mxu1 %v3458_v5 }
 0x593   :  { %1882 = vmatpush1.bf16.msra.mxu0 %v3461_v6  ;;  %1925 = vmatpush1.bf16.msra.mxu1 %v3464_v7 }
 0x594   :  { %1883 = vmatprep.subr.bf16.mxu0 %v3467_v8  ;;  %1926 = vmatprep.subr.bf16.mxu1 %v3470_v10 }
 0x597   :  { %1884 = vmatpush1.bf16.msra.mxu0 %v3473_v11  ;;  %1927 = vmatpush1.bf16.msra.mxu1 %v3476_v14 }
 0x598   :  { %1885 = vmatprep.subr.bf16.mxu0 %v3479_v52  ;;  %1928 = vmatprep.subr.bf16.mxu1 %v3482_v34 }
 0x59b   :  { %1886 = vmatpush1.bf16.msra.mxu0 %v3485_v17  ;;  %1929 = vmatpush1.bf16.msra.mxu1 %v3488_v25 }
 0x59c   :  { %1887 = vmatprep.subr.bf16.mxu0 %v3491_v26  ;;  %1930 = vmatprep.subr.bf16.mxu1 %v3494_v22 }
 0x59f   :  { %1888 = vmatpush1.bf16.msra.mxu0 %v3497_v24  ;;  %1931 = vmatpush1.bf16.msra.mxu1 %v3500_v60 }
 0x5a0   :  { %1889 = vmatprep.subr.bf16.mxu0 %v3503_v28  ;;  %1932 = vmatprep.subr.bf16.mxu1 %v3506_v9 }
 0x5a3   :  { %1890 = vmatpush1.bf16.msra.mxu0 %v3509_v32  ;;  %1933 = vmatpush1.bf16.msra.mxu1 %v3512_v0 }
 0x5a4   :  { %2045 = vmatprep.subr.bf16.mxu0 %v3397_v39  ;;  %2088 = vmatprep.subr.bf16.mxu1 %v3400_v40 }
 0x646   :  { %v1739_v13 = vpop.f32.mrf.mxu0  ;;  %v1782_v36 = vpop.f32.mrf.mxu1 }
 0x647   :  { %v1791_v18 = vadd.f32 %v1739_v13, %v3827_v21  ;;  %v1793_v31 = vadd.f32 %v1782_v36, %v3832_v12  ;;  %v3834_v21 = vld [vmem:[#allocation50_spill] sm:$0xff] }
 0x648   :  { %v1741_v19 = vpop.f32.mrf.mxu0  ;;  %v1784_v45 = vpop.f32.mrf.mxu1 }
 0x649   :  { %v2345_v37 = vmul.f32 -1.442695, %v1791_v18  ;;  %v1792_v39 = vadd.f32 %v1741_v19, %v3828_v38  ;;  %v1794_v15 = vadd.f32 %v1784_v45, %v3831_v2 }
 0x64a   :  { %v1743_v29 = vpop.f32.mrf.mxu0  ;;  %v1786_v50 = vpop.f32.mrf.mxu1 }
 0x64b   :  { %2641 = vpow2.f32 %v2345_v37  ;;  %v2347_v40 = vmul.f32 -1.442695, %v1792_v39  ;;  %v1795_v54 = vadd.f32 %v1743_v29, %v3829_v57  ;;  %v2349_v48 = vmul.f32 -1.442695, %v1794_v15 }
 0x64c   :  { %v1745_v44 = vpop.f32.mrf.mxu0  ;;  %v1788_v55 = vpop.f32.mrf.mxu1  ;;  %v1797_v18 = vadd.f32 %v1786_v50, %v3834_v21 }
 0x64d   :  { %2643 = vpow2.f32 %v2347_v40  ;;  %v2346_v46 = vmul.f32 -1.442695, %v1795_v54  ;;  %v1796_v49 = vadd.f32 %v1745_v44, %v3830_v47  ;;  %v1798_v42 = vadd.f32 %v1788_v55, %v3833_v41 }
 0x64f   :  { %2645 = vpow2.f32 %v2346_v46  ;;  %v2348_v53 = vmul.f32 -1.442695, %v1796_v49  ;;  %v2350_v38 = vmul.f32 -1.442695, %v1798_v42 }
 0x651   :  { %2647 = vpow2.f32 %v2348_v53 }
 0x652   :  { %2649 = vtanh.f32 %v1793_v31 }
 0x653   :  { %2651 = vpow2.f32 %v2349_v48 }
 0x658   :  { %v2642_v13 = vpop.eup %2641 }
 0x659   :  { %v1805_v19 = vadd.f32 1.0, %v2642_v13  ;;  %v1855_v13 = vpop.permute.xlu0 %1854 }
 0x65a   :  { %v2644_v37 = vpop.eup %2643  ;;  %vm1859_vm8 = vcmp.eq.s32.totalorder %v1855_v13, 1 }
 0x65b   :  { %2653 = vrcp.f32 %v1805_v19  ;;  %v1817_v39 = vadd.f32 1.0, %v2644_v37  ;;  %v1858_v19 = vpop.permute.xlu1 %1857 }
 0x65c   :  { %v2646_v29 = vpop.eup %2645  ;;  %2655 = vtanh.f32 %v1797_v18  ;;  %vm1860_vm9 = vcmp.eq.s32.totalorder %v1858_v19, 1 }
 0x65d   :  { %2657 = vrcp.f32 %v1817_v39  ;;  %v1806_v40 = vadd.f32 1.0, %v2646_v29 }
 0x65e   :  { %v2648_v45 = vpop.eup %2647  ;;  %2659 = vpow2.f32 %v2350_v38 }
 0x65f   :  { %2661 = vrcp.f32 %v1806_v40  ;;  %v1818_v36 = vadd.f32 1.0, %v2648_v45  ;;  %v2650_v57 = vpop.eup %2649 }
 0x660   :  { %v2652_v54 = vpop.eup %2651 }
 0x661   :  { %2663 = vrcp.f32 %v1818_v36  ;;  %v1831_v50 = vadd.f32 1.0, %v2652_v54 }
 0x663   :  { %2665 = vrcp.f32 %v1831_v50 }
 0x668   :  { %v2654_v44 = vpop.eup %2653 }
 0x669   :  { %v2656_v46 = vpop.eup %2655  ;;  %v1839_v47 = vmul.f32 %v2654_v44, %v2650_v57 }
 0x66a   :  { %v2658_v49 = vpop.eup %2657 }
 0x66b   :  { %v2660_v53 = vpop.eup %2659  ;;  %v1837_v2 = vmul.f32 %v2658_v49, %v3590_v51 }
 0x66c   :  { %v2662_v15 = vpop.eup %2661  ;;  %v1832_v48 = vadd.f32 1.0, %v2660_v53 }
 0x66d   :  { %v3650_v55 = vadd.f32 %v1839_v47, %v1837_v2  ;;  %v1840_v12 = vmul.f32 %v2662_v15, %v2656_v46 }
 0x66e   :  { %v2664_v31 = vpop.eup %2663 }
 0x66f   :  { %v1838_v41 = vmul.f32 %v2664_v31, %v3594_v43  ;;  %2667 = vtanh.f32 %v3650_v55 }
 0x670   :  { %2669 = vrcp.f32 %v1832_v48  ;;  %v2666_v21 = vpop.eup %2665 }
 0x671   :  { %v3654_v42 = vadd.f32 %v1840_v12, %v1838_v41 }
 0x673   :  { %2671 = vtanh.f32 %v3654_v42 }
 0x67c   :  { %v2668_v18 = vpop.eup %2667 }
 0x67d   :  { %v1845_v51 = vmul.f32 %v2668_v18, %v2666_v21  ;;  %v2670_v37 = vpop.eup %2669 }
 0x67f   :  { %v3658_v38 = vsel %vm1859_vm8, %v1845_v51, %v3598_v27 }
 0x680   :  { %v2672_v39 = vpop.eup %2671 }
 0x681   :  { %v1846_v43 = vmul.f32 %v2672_v39, %v2670_v37  ;;  %v2025_v37 = vpop.permute.xlu0 %2024 }
 0x682   :  { %vm2029_vm12 = vcmp.eq.s32.totalorder %v2025_v37, 1 }
 0x683   :  { %v3661_v29 = vsel %vm1860_vm9, %v1846_v43, %v3601_v30  ;;  %v1874_v40 = vpack.c.bf16 %v1846_v43, %v1845_v51 }
 0x685   :  { %1908 = vmatmul.mubr.bf16.vlgmr.msra.gmra.mxu0 %v1874_v40  ;;  %1951 = vmatmul.mubr.bf16.vlgmr.msra.gmra.mxu1 %v1874_v40  ;;  %v2028_v40 = vpop.permute.xlu1 %2027 }
 0x686   :  { %2046 = vmatpush1.bf16.msra.mxu0 %v3359_v35  ;;  %2089 = vmatpush1.bf16.msra.mxu1 %v3362_v33  ;;  %v2192_v35 = vsel %vm2190_vm10, 1, %v3797_v20  ;;  %v2191_v33 = vsel %vm2189_vm11, 1, %v3797_v20  ;;  %vm2030_vm13 = vcmp.eq.s32.totalorder %v2028_v40, 1 }
 0x687   :  { %2047 = vmatprep.subr.bf16.mxu0 %v3365_v23  ;;  %2090 = vmatprep.subr.bf16.mxu1 %v3432_v56  ;;  %v3835_v56 = vld [vmem:[#allocation53_spill] sm:$0xff] }
 0x688   :  { %2077 = vmatprep.mubr.bf16.mxu0 %v3797_v20  ;;  %2120 = vmatprep.mubr.bf16.mxu1 %v3797_v20  ;;  %v3838_v20 = vld [vmem:[#allocation59_spill] sm:$0xff] }
 0x689   :  { %2197 = vperm.xlu1 %2376, %v2192_v35   ;;  %2194 = vperm.xlu0 %2375, %v2191_v33  }
 0x68a   :  { %2048 = vmatpush1.bf16.msra.mxu0 %v3437_v16  ;;  %2091 = vmatpush1.bf16.msra.mxu1 %v3440_v3 }
 0x68b   :  { %2049 = vmatprep.subr.bf16.mxu0 %v3443_v58  ;;  %2092 = vmatprep.subr.bf16.mxu1 %v3446_v61 }
 0x68e   :  { %2050 = vmatpush1.bf16.msra.mxu0 %v3449_v63  ;;  %2093 = vmatpush1.bf16.msra.mxu1 %v3452_v1  ;;  %v3836_v63 = vld [vmem:[#allocation55_spill] sm:$0xff] }
 0x68f   :  { %2051 = vmatprep.subr.bf16.mxu0 %v3455_v4  ;;  %2094 = vmatprep.subr.bf16.mxu1 %v3458_v5 }
 0x692   :  { %2052 = vmatpush1.bf16.msra.mxu0 %v3461_v6  ;;  %2095 = vmatpush1.bf16.msra.mxu1 %v3464_v7  ;;  %v3837_v6 = vld [vmem:[#allocation57_spill] sm:$0xff] }
 0x693   :  { %2053 = vmatprep.subr.bf16.mxu0 %v3467_v8  ;;  %2096 = vmatprep.subr.bf16.mxu1 %v3470_v10 }
 0x696   :  { %2054 = vmatpush1.bf16.msra.mxu0 %v3473_v11  ;;  %2097 = vmatpush1.bf16.msra.mxu1 %v3476_v14 }
 0x697   :  { %2055 = vmatprep.subr.bf16.mxu0 %v3479_v52  ;;  %2098 = vmatprep.subr.bf16.mxu1 %v3482_v34  ;;  %v3839_v52 = vld [vmem:[#allocation56_spill] sm:$0xff] }
 0x69a   :  { %2056 = vmatpush1.bf16.msra.mxu0 %v3485_v17  ;;  %2099 = vmatpush1.bf16.msra.mxu1 %v3488_v25  ;;  %v3840_v25 = vld [vmem:[#allocation54_spill] sm:$0xff] }
 0x69b   :  { %2057 = vmatprep.subr.bf16.mxu0 %v3491_v26  ;;  %2100 = vmatprep.subr.bf16.mxu1 %v3494_v22 }
 0x69e   :  { %2058 = vmatpush1.bf16.msra.mxu0 %v3497_v24  ;;  %2101 = vmatpush1.bf16.msra.mxu1 %v3500_v60  ;;  %v3841_v24 = vld [vmem:[#allocation60_spill] sm:$0xff] }
 0x69f   :  { %2059 = vmatprep.subr.bf16.mxu0 %v3503_v28  ;;  %2102 = vmatprep.subr.bf16.mxu1 %v3506_v9  ;;  %v3842_v9 = vld [vmem:[#allocation58_spill] sm:$0xff] }
 0x6a2   :  { %2060 = vmatpush1.bf16.msra.mxu0 %v3509_v32  ;;  %2103 = vmatpush1.bf16.msra.mxu1 %v3512_v0 }
 0x704   :  { %v2195_v40 = vpop.permute.xlu0 %2194 }
 0x705   :  { %vm2199_vm14 = vcmp.eq.s32.totalorder %v2195_v40, 1 }
 0x745   :  { %v1909_v23 = vpop.f32.mrf.mxu0  ;;  %v1952_v3 = vpop.f32.mrf.mxu1 }
 0x746   :  { %v1961_v16 = vadd.f32 %v1909_v23, %v3835_v56  ;;  %v1963_v26 = vadd.f32 %v1952_v3, %v3840_v25 }
 0x747   :  { %v1911_v58 = vpop.f32.mrf.mxu0  ;;  %v1954_v62 = vpop.f32.mrf.mxu1 }
 0x748   :  { %v2351_v61 = vmul.f32 -1.442695, %v1961_v16  ;;  %v1962_v1 = vadd.f32 %v1911_v58, %v3836_v63  ;;  %v1964_v34 = vadd.f32 %v1954_v62, %v3839_v52  ;;  %v3843_v58 = vld [vmem:[#allocation61_spill] sm:$0xff] }
 0x749   :  { %v1913_v4 = vpop.f32.mrf.mxu0  ;;  %v1956_v11 = vpop.f32.mrf.mxu1 }
 0x74a   :  { %2673 = vpow2.f32 %v2351_v61  ;;  %v2353_v5 = vmul.f32 -1.442695, %v1962_v1  ;;  %v1965_v59 = vadd.f32 %v1913_v4, %v3837_v6  ;;  %v2355_v22 = vmul.f32 -1.442695, %v1964_v34  ;;  %v3847_v34 = vld [vmem:[#allocation64_spill] sm:$0xff] }
 0x74b   :  { %v1915_v7 = vpop.f32.mrf.mxu0  ;;  %v1958_v17 = vpop.f32.mrf.mxu1  ;;  %v1967_v32 = vadd.f32 %v1956_v11, %v3842_v9 }
 0x74c   :  { %2675 = vpow2.f32 %v2353_v5  ;;  %v2352_v8 = vmul.f32 -1.442695, %v1965_v59  ;;  %v1966_v10 = vadd.f32 %v1915_v7, %v3838_v20  ;;  %v1968_v60 = vadd.f32 %v1958_v17, %v3841_v24  ;;  %v3844_v5 = vld [vmem:[#allocation63_spill] sm:$0xff]  ;;  %v3845_v7 = vld [vmem:[#allocation65_spill] sm:$0xff] }
 0x74e   :  { %2677 = vpow2.f32 %v2352_v8  ;;  %v2354_v14 = vmul.f32 -1.442695, %v1966_v10  ;;  %v2356_v30 = vmul.f32 -1.442695, %v1968_v60  ;;  %v3846_v10 = vld [vmem:[#allocation67_spill] sm:$0xff]  ;;  %v3849_v60 = vld [vmem:[#allocation68_spill] sm:$0xff] }
 0x750   :  { %2679 = vpow2.f32 %v2354_v14 }
 0x751   :  { %2681 = vtanh.f32 %v1963_v26  ;;  %v3848_v26 = vld [vmem:[#allocation62_spill] sm:$0xff] }
 0x752   :  { %2683 = vpow2.f32 %v2355_v22 }
 0x757   :  { %v2674_v28 = vpop.eup %2673 }
 0x758   :  { %v1975_v0 = vadd.f32 1.0, %v2674_v28 }
 0x759   :  { %v2676_v27 = vpop.eup %2675 }
 0x75a   :  { %2685 = vrcp.f32 %v1975_v0  ;;  %v1987_v45 = vadd.f32 1.0, %v2676_v27 }
 0x75b   :  { %v2678_v36 = vpop.eup %2677  ;;  %2687 = vtanh.f32 %v1967_v32  ;;  %v3850_v32 = vld [vmem:[#allocation66_spill] sm:$0xff] }
 0x75c   :  { %2689 = vrcp.f32 %v1987_v45  ;;  %v1976_v57 = vadd.f32 1.0, %v2678_v36 }
 0x75d   :  { %v2680_v54 = vpop.eup %2679  ;;  %2691 = vpow2.f32 %v2356_v30 }
 0x75e   :  { %2693 = vrcp.f32 %v1976_v57  ;;  %v1988_v44 = vadd.f32 1.0, %v2680_v54  ;;  %v2682_v46 = vpop.eup %2681 }
 0x75f   :  { %v2684_v47 = vpop.eup %2683 }
 0x760   :  { %2695 = vrcp.f32 %v1988_v44  ;;  %v2001_v15 = vadd.f32 1.0, %v2684_v47 }
 0x762   :  { %2697 = vrcp.f32 %v2001_v15 }
 0x767   :  { %v2686_v49 = vpop.eup %2685 }
 0x768   :  { %v2688_v50 = vpop.eup %2687  ;;  %v2009_v53 = vmul.f32 %v2686_v49, %v2682_v46 }
 0x769   :  { %v2690_v2 = vpop.eup %2689 }
 0x76a   :  { %v2692_v12 = vpop.eup %2691  ;;  %v2007_v31 = vmul.f32 %v2690_v2, %v3650_v55 }
 0x76b   :  { %v2694_v48 = vpop.eup %2693  ;;  %v2002_v18 = vadd.f32 1.0, %v2692_v12 }
 0x76c   :  { %v3708_v41 = vadd.f32 %v2009_v53, %v2007_v31  ;;  %v2010_v13 = vmul.f32 %v2694_v48, %v2688_v50 }
 0x76d   :  { %v2696_v21 = vpop.eup %2695 }
 0x76e   :  { %v2008_v51 = vmul.f32 %v2696_v21, %v3654_v42  ;;  %2699 = vtanh.f32 %v3708_v41 }
 0x76f   :  { %2701 = vrcp.f32 %v2002_v18  ;;  %v2698_v39 = vpop.eup %2697 }
 0x770   :  { %v3712_v19 = vadd.f32 %v2010_v13, %v2008_v51 }
 0x772   :  { %2703 = vtanh.f32 %v3712_v19 }
 0x77b   :  { %v2700_v43 = vpop.eup %2699 }
 0x77c   :  { %v2015_v55 = vmul.f32 %v2700_v43, %v2698_v39  ;;  %v2702_v35 = vpop.eup %2701 }
 0x77e   :  { %v3716_v33 = vsel %vm2029_vm12, %v2015_v55, %v3658_v38 }
 0x77f   :  { %v2704_v23 = vpop.eup %2703 }
 0x780   :  { %v2016_v42 = vmul.f32 %v2704_v23, %v2702_v35 }
 0x782   :  { %v3719_v56 = vsel %vm2030_vm13, %v2016_v42, %v3661_v29  ;;  %v2044_v16 = vpack.c.bf16 %v2016_v42, %v2015_v55 }
 0x784   :  { %2078 = vmatmul.mubr.bf16.vlgmr.msra.gmra.mxu0 %v2044_v16  ;;  %2121 = vmatmul.mubr.bf16.vlgmr.msra.gmra.mxu1 %v2044_v16  ;;  %v2198_v16 = vpop.permute.xlu1 %2197 }
 0x785   :  { %vm2200_vm15 = vcmp.eq.s32.totalorder %v2198_v16, 1 }
 0x844   :  { %v2079_v3 = vpop.f32.mrf.mxu0  ;;  %v2122_v63 = vpop.f32.mrf.mxu1 }
 0x845   :  { %v2131_v61 = vadd.f32 %v2079_v3, %v3843_v58  ;;  %v2133_v22 = vadd.f32 %v2122_v63, %v3848_v26 }
 0x846   :  { %v2081_v1 = vpop.f32.mrf.mxu0  ;;  %v2124_v59 = vpop.f32.mrf.mxu1 }
 0x847   :  { %v2357_v4 = vmul.f32 -1.442695, %v2131_v61  ;;  %v2132_v62 = vadd.f32 %v2081_v1, %v3844_v5  ;;  %v2134_v17 = vadd.f32 %v2124_v59, %v3847_v34 }
 0x848   :  { %v2083_v6 = vpop.f32.mrf.mxu0  ;;  %v2126_v14 = vpop.f32.mrf.mxu1 }
 0x849   :  { %2705 = vpow2.f32 %v2357_v4  ;;  %v2359_v38 = vmul.f32 -1.442695, %v2132_v62  ;;  %v2135_v8 = vadd.f32 %v2083_v6, %v3845_v7  ;;  %v2361_v24 = vmul.f32 -1.442695, %v2134_v17 }
 0x84a   :  { %v2085_v20 = vpop.f32.mrf.mxu0  ;;  %v2128_v25 = vpop.f32.mrf.mxu1  ;;  %v2137_v0 = vadd.f32 %v2126_v14, %v3850_v32 }
 0x84b   :  { %2707 = vpow2.f32 %v2359_v38  ;;  %v2358_v29 = vmul.f32 -1.442695, %v2135_v8  ;;  %v2136_v11 = vadd.f32 %v2085_v20, %v3846_v10  ;;  %v2138_v28 = vadd.f32 %v2128_v25, %v3849_v60 }
 0x84d   :  { %2709 = vpow2.f32 %v2358_v29  ;;  %v2360_v52 = vmul.f32 -1.442695, %v2136_v11  ;;  %v2362_v45 = vmul.f32 -1.442695, %v2138_v28 }
 0x84f   :  { %2711 = vpow2.f32 %v2360_v52 }
 0x850   :  { %2713 = vtanh.f32 %v2133_v22 }
 0x851   :  { %2715 = vpow2.f32 %v2361_v24 }
 0x856   :  { %v2706_v9 = vpop.eup %2705 }
 0x857   :  { %v2145_v27 = vadd.f32 1.0, %v2706_v9 }
 0x858   :  { %v2708_v30 = vpop.eup %2707 }
 0x859   :  { %2717 = vrcp.f32 %v2145_v27  ;;  %v2157_v36 = vadd.f32 1.0, %v2708_v30 }
 0x85a   :  { %v2710_v57 = vpop.eup %2709  ;;  %2719 = vtanh.f32 %v2137_v0 }
 0x85b   :  { %2721 = vrcp.f32 %v2157_v36  ;;  %v2146_v54 = vadd.f32 1.0, %v2710_v57 }
 0x85c   :  { %v2712_v44 = vpop.eup %2711  ;;  %2723 = vpow2.f32 %v2362_v45 }
 0x85d   :  { %2725 = vrcp.f32 %v2146_v54  ;;  %v2158_v46 = vadd.f32 1.0, %v2712_v44  ;;  %v2714_v47 = vpop.eup %2713 }
 0x85e   :  { %v2716_v49 = vpop.eup %2715 }
 0x85f   :  { %2727 = vrcp.f32 %v2158_v46  ;;  %v2171_v12 = vadd.f32 1.0, %v2716_v49 }
 0x861   :  { %2729 = vrcp.f32 %v2171_v12 }
 0x866   :  { %v2718_v50 = vpop.eup %2717 }
 0x867   :  { %v2720_v53 = vpop.eup %2719  ;;  %v2179_v2 = vmul.f32 %v2718_v50, %v2714_v47 }
 0x868   :  { %v2722_v15 = vpop.eup %2721 }
 0x869   :  { %v2724_v31 = vpop.eup %2723  ;;  %v2177_v48 = vmul.f32 %v2722_v15, %v3708_v41 }
 0x86a   :  { %v2726_v13 = vpop.eup %2725  ;;  %v2172_v37 = vadd.f32 1.0, %v2724_v31 }
 0x86b   :  { %v2180_v21 = vmul.f32 %v2726_v13, %v2720_v53  ;;  %v2181_v18 = vadd.f32 %v2179_v2, %v2177_v48 }
 0x86c   :  { %v2728_v51 = vpop.eup %2727 }
 0x86d   :  { %v2178_v39 = vmul.f32 %v2728_v51, %v3712_v19  ;;  %2731 = vtanh.f32 %v2181_v18 }
 0x86e   :  { %2733 = vrcp.f32 %v2172_v37  ;;  %v2730_v55 = vpop.eup %2729 }
 0x86f   :  { %v2182_v43 = vadd.f32 %v2180_v21, %v2178_v39 }
 0x871   :  { %2735 = vtanh.f32 %v2182_v43 }
 0x87a   :  { %v2732_v35 = vpop.eup %2731 }
 0x87b   :  { %v2185_v23 = vmul.f32 %v2732_v35, %v2730_v55  ;;  %v2734_v42 = vpop.eup %2733 }
 0x87d   :  { %v2201_v41 = vsel %vm2199_vm14, %v2185_v23, %v3716_v33 }
 0x87e   :  { %v2736_v3 = vpop.eup %2735  ;;  %2214 = vst [vmem:[#allocation12] sm:$0xff] %v2201_v41 }
 0x87f   :  { %v2186_v58 = vmul.f32 %v2736_v3, %v2734_v42 }
 0x881   :  { %v2202_v19 = vsel %vm2200_vm15, %v2186_v58, %v3719_v56 }
 0x882   :  { %2215 = vst [vmem:[#allocation12 + $0x8] sm:$0xff] %v2202_v19 }
 0x883   :  { %2840 = shalt.err (!%p2837_p5)
}
 0x884   :  { %s2865_s16 = smov 128   ;;  %s2866_s17 = smov 8  }
 0x885   :  { %2227 = dma.vmem_to_hbm [thread:$0]  %s2222_s14, 256, %s3741_s5, [#allocation8], %s2865_s16, %s2865_s16, %s2866_s17  }
 0x886   :  { %2853 = dma.done.wait [#allocation8], 256  }
 0x887   :  { %2854 = vsyncadd [#allocation8], 4294967040 }
 0x888   :  { %2231 = vsyncpa [#allocation7], 1 }
 0x889   :  { %2232 = vsyncpa [#allocation10], 1 }
 0x88a   :  { %2233 = vsyncpa [#allocation8], 1 }

</bundles_post_ra>
